<compile_context>
chip_gen: v7x
topology: tpu7x:2x2x1
jax: 0.10.0
libtpu: 0.0.40
codegen_flags: <defaults>
</compile_context>

<pallas_src>
import functools

import jax
import jax.numpy as jnp
from jax.experimental import pallas as pl
from jax.experimental.pallas import tpu as pltpu


# ----------------------------- Pallas kernels ------------------------------


def _im2col_patches(xpad_ref, ho, wo, stride):
    """Gather the nine 3x3 taps (strided for stride>1) from the padded VMEM
    scratch and fuse them into a single (ho*wo, 9*Cin) im2col operand."""
    cin = xpad_ref.shape[-1]
    taps = []
    for dy in range(3):
        for dx in range(3):
            if stride == 1:
                taps.append(xpad_ref[dy:dy + ho, dx:dx + wo, :])
            else:
                taps.append(xpad_ref[pl.ds(dy, ho, stride=stride),
                                     pl.ds(dx, wo, stride=stride), :])
    return jnp.concatenate(taps, axis=-1).reshape(ho * wo, 9 * cin)


def _conv3x3_bnrelu_kernel(x_ref, w_ref, scale_ref, shift_ref, o_ref,
                           xpad_ref, *, stride):
    """ZeroPad2d(1) + Conv2d(3x3, stride, bias=False) + BN(eval) + ReLU.

    x_ref:       (H, W, Cin)      bf16 activations
    w_ref:       (9*Cin, Cout)    bf16 im2col weights (tap-major, chan-minor)
    scale/shift: (1, Cout)        f32 folded BatchNorm
    o_ref:       (Ho, Wo, Cout)   bf16, Ho = H // stride
    xpad_ref:    (H+2, W+2, Cin)  f32 VMEM scratch (padding done on-chip)
    """
    H, W, _ = x_ref.shape
    Ho, Wo, Cout = o_ref.shape
    # Zero-pad in VMEM (no jnp.pad HBM round trip). Re-zeroed every grid step
    # so it is correct when the batch axis is sharded across TensorCores.
    xpad_ref[...] = jnp.zeros(xpad_ref.shape, xpad_ref.dtype)
    xpad_ref[1:H + 1, 1:W + 1, :] = x_ref[...].astype(xpad_ref.dtype)
    # Single im2col matmul (direct strided computation for stride > 1).
    patches = _im2col_patches(xpad_ref, Ho, Wo, stride)
    acc = jnp.dot(patches.astype(jnp.bfloat16), w_ref[...],
                  preferred_element_type=jnp.float32)        # bf16 MXU, f32 acc
    y = acc * scale_ref[...] + shift_ref[...]                # f32 epilogue
    o_ref[...] = jnp.maximum(y, 0.0).reshape(Ho, Wo, Cout).astype(o_ref.dtype)


def _conv3x3_stack_bnrelu_kernel(x_ref, w_ref, scale_ref, shift_ref, o_ref,
                                 xpad_ref):
    """L fused stride-1 [Conv3x3 + BN + ReLU] layers (Cin == Cout == C); the
    activation never leaves VMEM between layers.

    x_ref: (H, W, C) bf16; w_ref: (L, 9*C, C) bf16; scale/shift: (L, 1, C) f32;
    o_ref: (H, W, C) bf16; xpad_ref: (H+2, W+2, C) f32 scratch.
    """
    H, W, C = x_ref.shape
    L = w_ref.shape[0]
    xpad_ref[...] = jnp.zeros(xpad_ref.shape, xpad_ref.dtype)
    xpad_ref[1:H + 1, 1:W + 1, :] = x_ref[...].astype(xpad_ref.dtype)
    for l in range(L):
        patches = _im2col_patches(xpad_ref, H, W, 1)
        acc = jnp.dot(patches.astype(jnp.bfloat16), w_ref[l],
                      preferred_element_type=jnp.float32)
        y = jnp.maximum(acc * scale_ref[l] + shift_ref[l], 0.0)
        if l + 1 < L:
            # Write back into the (still zero-bordered) padded scratch.
            xpad_ref[1:H + 1, 1:W + 1, :] = y.reshape(H, W, C)
        else:
            o_ref[...] = y.reshape(H, W, C).astype(o_ref.dtype)


def _deconv_bnrelu_kernel(x_ref, w_ref, scale_ref, shift_ref, o_ref):
    """One row phase (dy) of ConvTranspose2d(kernel == stride) + BN + ReLU.
    The dx phases and Cout are folded into the matmul N axis, so the store is
    a single lane-dense full-block write.

    x_ref: (H, W, Cin) bf16; w_ref: (Cin, s*Cout) bf16 for this dy;
    scale/shift: (1, s*Cout) f32; o_ref: (H, W, s*Cout) bf16.
    """
    H, W, Cin = x_ref.shape
    N = o_ref.shape[-1]
    xf = x_ref[...].reshape(H * W, Cin)
    acc = jnp.dot(xf, w_ref[...], preferred_element_type=jnp.float32)
    y = acc * scale_ref[...] + shift_ref[...]
    o_ref[...] = jnp.maximum(y, 0.0).reshape(H, W, N).astype(o_ref.dtype)


# ------------------------------ JAX wrappers --------------------------------


def conv3x3_bn_relu(x, w, scale, shift, stride):
    """x: (B, H, W, Cin) bf16 NHWC; w: (9*Cin, Cout) bf16."""
    B, H, W, Cin = x.shape
    Cout = w.shape[-1]
    Ho, Wo = H // stride, W // stride
    return pl.pallas_call(
        functools.partial(_conv3x3_bnrelu_kernel, stride=stride),
        out_shape=jax.ShapeDtypeStruct((B, Ho, Wo, Cout), jnp.bfloat16),
        grid=(B,),
        in_specs=[
            pl.BlockSpec((None, H, W, Cin), lambda b: (b, 0, 0, 0)),
            pl.BlockSpec((9 * Cin, Cout), lambda b: (0, 0)),
            pl.BlockSpec((1, Cout), lambda b: (0, 0)),
            pl.BlockSpec((1, Cout), lambda b: (0, 0)),
        ],
        out_specs=pl.BlockSpec((None, Ho, Wo, Cout), lambda b: (b, 0, 0, 0)),
        scratch_shapes=[pltpu.VMEM((H + 2, W + 2, Cin), jnp.float32)],
        compiler_params=pltpu.CompilerParams(
            dimension_semantics=("parallel",)),
    )(x, w, scale, shift)


def conv3x3_stack_bn_relu(x, w, scale, shift):
    """x: (B, H, W, C) bf16; w: (L, 9*C, C) bf16 -- L fused stride-1 layers."""
    B, H, W, C = x.shape
    L = w.shape[0]
    return pl.pallas_call(
        _conv3x3_stack_bnrelu_kernel,
        out_shape=jax.ShapeDtypeStruct((B, H, W, C), jnp.bfloat16),
        grid=(B,),
        in_specs=[
            pl.BlockSpec((None, H, W, C), lambda b: (b, 0, 0, 0)),
            pl.BlockSpec((L, 9 * C, C), lambda b: (0, 0, 0)),
            pl.BlockSpec((L, 1, C), lambda b: (0, 0, 0)),
            pl.BlockSpec((L, 1, C), lambda b: (0, 0, 0)),
        ],
        out_specs=pl.BlockSpec((None, H, W, C), lambda b: (b, 0, 0, 0)),
        scratch_shapes=[pltpu.VMEM((H + 2, W + 2, C), jnp.float32)],
        compiler_params=pltpu.CompilerParams(
            dimension_semantics=("parallel",)),
    )(x, w, scale, shift)


def deconv_bn_relu(x, w, scale, shift, stride):
    """x: (B, H, W, Cin) bf16; w: (s, Cin, s*Cout) bf16 (row phase dy leading,
    the dx/Cout taps folded into the last axis); scale/shift: (1, s*Cout) f32.
    ConvTranspose2d(k=stride, stride=stride, bias=False) + BN(folded) + ReLU."""
    B, H, W, Cin = x.shape
    s = stride
    N = w.shape[-1]                       # s * Cout
    Cout = N // s
    out = pl.pallas_call(
        _deconv_bnrelu_kernel,
        out_shape=jax.ShapeDtypeStruct((B, H, s, W, N), jnp.bfloat16),
        grid=(B, s),
        in_specs=[
            pl.BlockSpec((None, H, W, Cin), lambda b, t: (b, 0, 0, 0)),
            pl.BlockSpec((None, Cin, N), lambda b, t: (t, 0, 0)),
            pl.BlockSpec((1, N), lambda b, t: (0, 0)),
            pl.BlockSpec((1, N), lambda b, t: (0, 0)),
        ],
        out_specs=pl.BlockSpec((None, H, None, W, N),
                               lambda b, t: (b, 0, t, 0, 0)),
        compiler_params=pltpu.CompilerParams(
            dimension_semantics=("parallel", "parallel")),
    )(x, w, scale, shift)
    # (B, H, s, W, s*Cout) -> (B, H*s, W*s, Cout): row-major order already
    # interleaves the taps, so this is a pure reshape (no XLA transpose pass).
    return out.reshape(B, H * s, W * s, Cout)


# --------------------------- parameter generation ---------------------------


def _fold_bn(key, c, eps=1e-3):
    k1, k2, k3, k4 = jax.random.split(key, 4)
    gamma = jax.random.uniform(k1, (c,), jnp.float32, 0.5, 1.5)
    beta = 0.1 * jax.random.normal(k2, (c,), jnp.float32)
    mean = 0.1 * jax.random.normal(k3, (c,), jnp.float32)
    var = jax.random.uniform(k4, (c,), jnp.float32, 0.5, 1.5)
    scale = gamma * jax.lax.rsqrt(var + eps)
    shift = beta - mean * scale
    return scale.reshape(1, c), shift.reshape(1, c)


def init_params(key, cfg):
    params = {'blocks': [], 'deblocks': []}
    c_in_list = [cfg.num_bev_features] + list(cfg.num_filters[:-1])
    num_levels = len(cfg.layer_nums)
    for idx in range(num_levels):
        cout = cfg.num_filters[idx]
        cin = c_in_list[idx]
        # First (possibly strided) conv of the block: im2col weights (9*Cin, Cout).
        key, kw, kb = jax.random.split(key, 3)
        w0 = jax.random.normal(kw, (9 * cin, cout), jnp.float32) / (9.0 * cin) ** 0.5
        sc0, sh0 = _fold_bn(kb, cout)
        first = {'w': w0.astype(jnp.bfloat16), 'scale': sc0, 'shift': sh0}
        # Remaining stride-1 convs, stacked so one pallas_call runs them all.
        L = cfg.layer_nums[idx]
        rest = None
        if L > 0:
            ws, scs, shs = [], [], []
            for _ in range(L):
                key, kw, kb = jax.random.split(key, 3)
                ws.append(jax.random.normal(kw, (9 * cout, cout), jnp.float32)
                          / (9.0 * cout) ** 0.5)
                sc, sh = _fold_bn(kb, cout)
                scs.append(sc)
                shs.append(sh)
            rest = {'w': jnp.stack(ws).astype(jnp.bfloat16),
                    'scale': jnp.stack(scs), 'shift': jnp.stack(shs)}
        params['blocks'].append({'first': first, 'rest': rest})

        s = cfg.upsample_strides[idx]
        assert s >= 1  # TODO(synk): fractional upsample_strides (<1, downsampling conv) not implemented
        cup = cfg.num_upsample_filters[idx]
        key, kw, kb = jax.random.split(key, 3)
        wd = jax.random.normal(kw, (s, cout, s * cup), jnp.float32) / (s * s * cout) ** 0.5
        scd, shd = _fold_bn(kb, cup)
        params['deblocks'].append({'w': wd.astype(jnp.bfloat16),
                                   'scale': jnp.tile(scd, (1, s)),
                                   'shift': jnp.tile(shd, (1, s))})
    # TODO(synk): extra trailing deblock when len(upsample_strides) > num_levels (not used in this cfg)
    return params


# ------------------------------ forward pass ---------------------------------


def bev_backbone_forward(x_nchw, params, cfg):
    """Mirrors BevBackbone.forward; inputs/outputs are NCHW f32 like PyTorch."""
    x = jnp.transpose(x_nchw, (0, 2, 3, 1)).astype(jnp.bfloat16)   # NHWC bf16
    spatial_h = x.shape[1]
    ups, ret = [], {}
    cur = x
    for i in range(len(cfg.layer_nums)):
        blk = params['blocks'][i]
        cur = conv3x3_bn_relu(cur, blk['first']['w'], blk['first']['scale'],
                              blk['first']['shift'], cfg.layer_strides[i])
        if blk['rest'] is not None:
            cur = conv3x3_stack_bn_relu(cur, blk['rest']['w'],
                                        blk['rest']['scale'],
                                        blk['rest']['shift'])
        stride = spatial_h // cur.shape[1]
        ret['spatial_features_%dx' % stride] = (
            jnp.transpose(cur, (0, 3, 1, 2)).astype(jnp.float32))
        db = params['deblocks'][i]
        ups.append(deconv_bn_relu(cur, db['w'], db['scale'], db['shift'],
                                  cfg.upsample_strides[i]))
    out = jnp.concatenate(ups, axis=-1) if len(ups) > 1 else ups[0]
    ret['spatial_features_2d'] = (
        jnp.transpose(out, (0, 3, 1, 2)).astype(jnp.float32))      # back to NCHW
    return ret


# ----------------------------------- main ------------------------------------

if __name__ == "__main__":
    class Cfg:
        pass

    cfg = Cfg()
    cfg.layer_nums = [1, 1]
    cfg.layer_strides = [1, 2]
    cfg.num_filters = [8, 16]
    cfg.upsample_strides = [1, 2]
    cfg.num_upsample_filters = [16, 16]
    cfg.num_bev_features = 4

    key = jax.random.PRNGKey(0)
    kx, kp = jax.random.split(key)
    x = jax.random.normal(kx, (2, cfg.num_bev_features, 16, 16), jnp.float32)  # NCHW

    params = init_params(kp, cfg)
    out = bev_backbone_forward(x, params, cfg)
    jax.block_until_ready(out)

    assert out['spatial_features_2d'].shape == (2, sum(cfg.num_upsample_filters), 16, 16)
    assert out['spatial_features_1x'].shape == (2, 8, 16, 16)
    assert out['spatial_features_2x'].shape == (2, 16, 8, 8)
    assert bool(jnp.isfinite(out['spatial_features_2d']).all())
    print("KERNEL_OK")
</pallas_src>

<mosaic_0001>
module attributes {stable_mosaic.version = 11 : i64} {
  func.func @_conv3x3_bnrelu_kernel(%arg0: i32, %arg1: memref<1x16x16x4xbf16, #tpu.memory_space<vmem>>, %arg2: memref<36x8xbf16, #tpu.memory_space<vmem>>, %arg3: memref<1x8xf32, #tpu.memory_space<vmem>>, %arg4: memref<1x8xf32, #tpu.memory_space<vmem>>, %arg5: memref<1x16x16x8xbf16, #tpu.memory_space<vmem>>, %arg6: memref<18x18x4xf32, #tpu.memory_space<vmem>>) attributes {dimension_semantics = [#tpu.dimension_semantics<parallel>], iteration_bounds = array<i64: 2>, scalar_prefetch = 0 : i64, scratch_operands = 1 : i64, tpu.core_type = #tpu.core_type<tc>, window_params = [{transform_indices = @transform_0, window_bounds = array<i64: 1, 16, 16, 4>}, {pipeline_mode = #tpu.pipeline_mode<synchronous>, transform_indices = @transform_1, window_bounds = array<i64: 36, 8>}, {pipeline_mode = #tpu.pipeline_mode<synchronous>, transform_indices = @transform_2, window_bounds = array<i64: 1, 8>}, {pipeline_mode = #tpu.pipeline_mode<synchronous>, transform_indices = @transform_3, window_bounds = array<i64: 1, 8>}, {transform_indices = @transform_4, window_bounds = array<i64: 1, 16, 16, 8>}]} {
    %cst = arith.constant 0.000000e+00 : f32
    %0 = vector.broadcast %cst : f32 to vector<18x18x4xf32>
    %c0 = arith.constant 0 : index
    %c0_0 = arith.constant 0 : index
    %c0_1 = arith.constant 0 : index
    %1 = vector.load %arg6[%c0, %c0_0, %c0_1] : memref<18x18x4xf32, #tpu.memory_space<vmem>>, vector<18x18x4xf32>
    tpu.vector_store %arg6[%c0, %c0_0, %c0_1], %0 {strides = array<i32>} : memref<18x18x4xf32, #tpu.memory_space<vmem>>, vector<18x18x4xf32>,
    %c0_2 = arith.constant 0 : index
    %c0_3 = arith.constant 0 : index
    %c0_4 = arith.constant 0 : index
    %c0_5 = arith.constant 0 : index
    %2 = vector.load %arg1[%c0_2, %c0_3, %c0_4, %c0_5] : memref<1x16x16x4xbf16, #tpu.memory_space<vmem>>, vector<1x16x16x4xbf16>
    %3 = vector.shape_cast %2 : vector<1x16x16x4xbf16> to vector<16x16x4xbf16>
    %4 = arith.extf %3 : vector<16x16x4xbf16> to vector<16x16x4xf32>
    %c1 = arith.constant 1 : index
    %c1_6 = arith.constant 1 : index
    %c0_7 = arith.constant 0 : index
    %5 = vector.load %arg6[%c1, %c1_6, %c0_7] : memref<18x18x4xf32, #tpu.memory_space<vmem>>, vector<16x16x4xf32>
    tpu.vector_store %arg6[%c1, %c1_6, %c0_7], %4 {strides = array<i32>} : memref<18x18x4xf32, #tpu.memory_space<vmem>>, vector<16x16x4xf32>,
    %c0_8 = arith.constant 0 : index
    %c0_9 = arith.constant 0 : index
    %c0_10 = arith.constant 0 : index
    %6 = vector.load %arg6[%c0_8, %c0_9, %c0_10] : memref<18x18x4xf32, #tpu.memory_space<vmem>>, vector<16x16x4xf32>
    %c0_11 = arith.constant 0 : index
    %c1_12 = arith.constant 1 : index
    %c0_13 = arith.constant 0 : index
    %7 = vector.load %arg6[%c0_11, %c1_12, %c0_13] : memref<18x18x4xf32, #tpu.memory_space<vmem>>, vector<16x16x4xf32>
    %c0_14 = arith.constant 0 : index
    %c2 = arith.constant 2 : index
    %c0_15 = arith.constant 0 : index
    %8 = vector.load %arg6[%c0_14, %c2, %c0_15] : memref<18x18x4xf32, #tpu.memory_space<vmem>>, vector<16x16x4xf32>
    %c1_16 = arith.constant 1 : index
    %c0_17 = arith.constant 0 : index
    %c0_18 = arith.constant 0 : index
    %9 = vector.load %arg6[%c1_16, %c0_17, %c0_18] : memref<18x18x4xf32, #tpu.memory_space<vmem>>, vector<16x16x4xf32>
    %c1_19 = arith.constant 1 : index
    %c1_20 = arith.constant 1 : index
    %c0_21 = arith.constant 0 : index
    %10 = vector.load %arg6[%c1_19, %c1_20, %c0_21] : memref<18x18x4xf32, #tpu.memory_space<vmem>>, vector<16x16x4xf32>
    %c1_22 = arith.constant 1 : index
    %c2_23 = arith.constant 2 : index
    %c0_24 = arith.constant 0 : index
    %11 = vector.load %arg6[%c1_22, %c2_23, %c0_24] : memref<18x18x4xf32, #tpu.memory_space<vmem>>, vector<16x16x4xf32>
    %c2_25 = arith.constant 2 : index
    %c0_26 = arith.constant 0 : index
    %c0_27 = arith.constant 0 : index
    %12 = vector.load %arg6[%c2_25, %c0_26, %c0_27] : memref<18x18x4xf32, #tpu.memory_space<vmem>>, vector<16x16x4xf32>
    %c2_28 = arith.constant 2 : index
    %c1_29 = arith.constant 1 : index
    %c0_30 = arith.constant 0 : index
    %13 = vector.load %arg6[%c2_28, %c1_29, %c0_30] : memref<18x18x4xf32, #tpu.memory_space<vmem>>, vector<16x16x4xf32>
    %c2_31 = arith.constant 2 : index
    %c2_32 = arith.constant 2 : index
    %c0_33 = arith.constant 0 : index
    %14 = vector.load %arg6[%c2_31, %c2_32, %c0_33] : memref<18x18x4xf32, #tpu.memory_space<vmem>>, vector<16x16x4xf32>
    %15 = tpu.concatenate %6, %7, %8, %9, %10, %11, %12, %13, %14 in 2 : vector<16x16x4xf32>, vector<16x16x4xf32>, vector<16x16x4xf32>, vector<16x16x4xf32>, vector<16x16x4xf32>, vector<16x16x4xf32>, vector<16x16x4xf32>, vector<16x16x4xf32>, vector<16x16x4xf32> -> vector<16x16x36xf32>
    %16 = vector.shape_cast %15 : vector<16x16x36xf32> to vector<256x36xf32>
    %17 = arith.truncf %16 : vector<256x36xf32> to vector<256x36xbf16>
    %c0_34 = arith.constant 0 : index
    %c0_35 = arith.constant 0 : index
    %18 = vector.load %arg2[%c0_34, %c0_35] : memref<36x8xbf16, #tpu.memory_space<vmem>>, vector<36x8xbf16>
    %cst_36 = arith.constant dense<0.000000e+00> : vector<256x8xf32>
    %19 = tpu.matmul %17, %18, %cst_36 {dimension_numbers = #tpu.dot_dimension_numbers<[1], [0], [0], [1], [0, 0, 1, 1], [], []>} : vector<256x36xbf16>, vector<36x8xbf16>, vector<256x8xf32> -> vector<256x8xf32>
    %c0_37 = arith.constant 0 : index
    %c0_38 = arith.constant 0 : index
    %20 = vector.load %arg3[%c0_37, %c0_38] : memref<1x8xf32, #tpu.memory_space<vmem>>, vector<1x8xf32>
    %21 = vector.broadcast %20 : vector<1x8xf32> to vector<256x8xf32>
    %22 = arith.mulf %19, %21 : vector<256x8xf32>
    %c0_39 = arith.constant 0 : index
    %c0_40 = arith.constant 0 : index
    %23 = vector.load %arg4[%c0_39, %c0_40] : memref<1x8xf32, #tpu.memory_space<vmem>>, vector<1x8xf32>
    %24 = vector.broadcast %23 : vector<1x8xf32> to vector<256x8xf32>
    %25 = arith.addf %22, %24 : vector<256x8xf32>
    %cst_41 = arith.constant 0.000000e+00 : f32
    %26 = vector.broadcast %cst_41 : f32 to vector<256x8xf32>
    %27 = arith.maximumf %25, %26 : vector<256x8xf32>
    %28 = vector.shape_cast %27 : vector<256x8xf32> to vector<16x16x8xf32>
    %29 = arith.truncf %28 : vector<16x16x8xf32> to vector<16x16x8xbf16>
    %c0_42 = arith.constant 0 : index
    %c0_43 = arith.constant 0 : index
    %c0_44 = arith.constant 0 : index
    %c0_45 = arith.constant 0 : index
    %30 = vector.load %arg5[%c0_42, %c0_43, %c0_44, %c0_45] : memref<1x16x16x8xbf16, #tpu.memory_space<vmem>>, vector<1x16x16x8xbf16>
    %31 = vector.shape_cast %30 : vector<1x16x16x8xbf16> to vector<16x16x8xbf16>
    %32 = vector.shape_cast %29 : vector<16x16x8xbf16> to vector<1x16x16x8xbf16>
    tpu.vector_store %arg5[%c0_42, %c0_43, %c0_44, %c0_45], %32 {strides = array<i32>} : memref<1x16x16x8xbf16, #tpu.memory_space<vmem>>, vector<1x16x16x8xbf16>,
    return
  }
  func.func @transform_0(%arg0: i32) -> (i32, i32, i32, i32) {
    %c0_i32 = arith.constant 0 : i32
    %c0_i32_0 = arith.constant 0 : i32
    %c0_i32_1 = arith.constant 0 : i32
    %c0_i32_2 = arith.constant 0 : i32
    return %arg0, %c0_i32, %c0_i32_0, %c0_i32_1 : i32, i32, i32, i32
  }
  func.func @transform_1(%arg0: i32) -> (i32, i32) {
    %c0_i32 = arith.constant 0 : i32
    %c0_i32_0 = arith.constant 0 : i32
    %c0_i32_1 = arith.constant 0 : i32
    return %c0_i32, %c0_i32_0 : i32, i32
  }
  func.func @transform_2(%arg0: i32) -> (i32, i32) {
    %c0_i32 = arith.constant 0 : i32
    %c0_i32_0 = arith.constant 0 : i32
    %c0_i32_1 = arith.constant 0 : i32
    return %c0_i32, %c0_i32_0 : i32, i32
  }
  func.func @transform_3(%arg0: i32) -> (i32, i32) {
    %c0_i32 = arith.constant 0 : i32
    %c0_i32_0 = arith.constant 0 : i32
    %c0_i32_1 = arith.constant 0 : i32
    return %c0_i32, %c0_i32_0 : i32, i32
  }
  func.func @transform_4(%arg0: i32) -> (i32, i32, i32, i32) {
    %c0_i32 = arith.constant 0 : i32
    %c0_i32_0 = arith.constant 0 : i32
    %c0_i32_1 = arith.constant 0 : i32
    %c0_i32_2 = arith.constant 0 : i32
    return %arg0, %c0_i32, %c0_i32_0, %c0_i32_1 : i32, i32, i32, i32
  }
}

</mosaic_0001>

<bundles_post_ra>
// kernel: tpu_custom_call.1
= control target key start
LH: loop header
LB: loop body
LE: loop exit
PB: predicated region body
PF: predicated region fallthrough
CT: control target
= control target key end

     0   :  { %s3456_s15 = smov 0   ;;  %s4775_s0 = inlined_call_operand.vmem [shape: bf16[2,16,16,4], index: 0, kind: input, shape index: {}]   ;;  %s4776_s1 = inlined_call_operand.vmem [shape: bf16[36,8], index: 1, kind: input, shape index: {}]   ;;  %s4777_s2 = inlined_call_operand.vmem [shape: f32[1,8], index: 2, kind: input, shape index: {}]   ;;  %s4778_s3 = inlined_call_operand.vmem [shape: f32[1,8], index: 3, kind: input, shape index: {}]   ;;  %s4779_s4 = inlined_call_operand.vmem [shape: bf16[2,16,16,8], index: 4, kind: output, shape index: {}]  }
   0x1 LB: > { %s2504_s16 = sadd.s32 4294967295, %s3420_s15   ;;  %p2508_p0 = scmp.ge.s32.totalorder %s3420_s15, 1  ;;  %s3420_s15 = sphi %s3456_s15, %s14_s15  }
   0x2   : > { %p162_p1 = scmp.lt.s32.totalorder %s3420_s15, 3 }
   0x4   : > { %p163_p2 = pnand %p2508_p0, %p162_p1 }
   0x6   : > { %166 = sbr.rel (%p163_p2) target bundleno = 647 (0x287), region = 36 }
   0xd   : > { %vm199_vm0 = vcmask 31744   ;;  %vm202_vm1 = vcmask 25600   ;;  %p3466_p3 = scmp.lt.s32.totalorder %s2504_s16, 1  ;;  %v3422_v0 = vmov 0.0   ;;  %s3423_s22 = smov 4   ;;  %vm2013_vm2 = vcmask 1041408  }
   0xe   : > { %200 = vst.msk [vmem:[#allocation2] sm:$0xff] %vm199_vm0, %v3422_v0  ;;  %201 = vst.msk [vmem:[#allocation2 + $0x8] sm:$0xff] %vm199_vm0, %v3422_v0  ;;  %s3424_s23 = smov 8   ;;  %s3425_s24 = smov 12   ;;  %vm1697_vm3 = vcmask 64512   ;;  %vm1730_vm4 = vcmask 97280  }
   0xf   : > { %203 = vst.msk [vmem:[#allocation2 + $0x10] sm:$0x3] %vm202_vm1, %v3422_v0  ;;  %206 = vst.msk [vmem:[#allocation2 + $0x28] sm:$0x3] %vm202_vm1, %v3422_v0  ;;  %s4854_s16 = smov (!%p3466_p3, %s2504_s16), 1  ;;  %s3426_s25 = smov 16  }
  0x10   : > { %204 = vst.msk [vmem:[#allocation2 + $0x18] sm:$0xff] %vm199_vm0, %v3422_v0  ;;  %205 = vst.msk [vmem:[#allocation2 + $0x20] sm:$0xff] %vm199_vm0, %v3422_v0  ;;  %s2568_s18 = sshll.u32 %s4854_s16, 7  ;;  %s3427_s26 = smov 20   ;;  %vm1763_vm5 = vcmask 130048   ;;  %vm1796_vm6 = vcmask 162816  }
  0x11   : > { %207 = vst.msk [vmem:[#allocation2 + $0x30] sm:$0xff] %vm199_vm0, %v3422_v0  ;;  %208 = vst.msk [vmem:[#allocation2 + $0x38] sm:$0xff] %vm199_vm0, %v3422_v0  ;;  %s3536_s21 = scalar_lea.vmem %s4775_s0, %s2568_s18  ;;  %s3428_s29 = smov 24   ;;  %vm1829_vm7 = vcmask 195584   ;;  %vm1862_vm8 = vcmask 228352   ;;  %vm1895_vm9 = vcmask 261120  }
  0x12   : > { %209 = vst.msk [vmem:[#allocation2 + $0x40] sm:$0x3] %vm202_vm1, %v3422_v0  ;;  %212 = vst.msk [vmem:[#allocation2 + $0x58] sm:$0x3] %vm202_vm1, %v3422_v0  ;;  %v2666_v1 = vld [vmem:[%s3536_s21 + $0x8] sm:$0xff]   ;;  %v2603_v2 = vld [vmem:[%s3536_s21] sm:$0xff]   ;;  %s4651_s19 = scalar_lea.vmem %s4779_s4, %s2568_s18 }
  0x13   : > { %210 = vst.msk [vmem:[#allocation2 + $0x48] sm:$0xff] %vm199_vm0, %v3422_v0  ;;  %211 = vst.msk [vmem:[#allocation2 + $0x50] sm:$0xff] %vm199_vm0, %v3422_v0  ;;  %v2667_v3 = vld [vmem:[%s3536_s21 + $0x10] sm:$0xff]   ;;  %v2608_v4 = vunpack.c.l.bf16 %v2666_v1  ;;  %v2609_v5 = vunpack.c.h.bf16 %v2666_v1  ;;  %v2604_v6 = vunpack.c.l.bf16 %v2603_v2  ;;  %v2605_v7 = vunpack.c.h.bf16 %v2603_v2  ;;  %v2668_v8 = vld [vmem:[%s3536_s21 + $0x18] sm:$0xff]   ;;  %s3429_s8 = smov 28   ;;  %s3430_s9 = smov 32  }
  0x14   : > { %213 = vst.msk [vmem:[#allocation2 + $0x60] sm:$0xff] %vm199_vm0, %v3422_v0  ;;  %214 = vst.msk [vmem:[#allocation2 + $0x68] sm:$0xff] %vm199_vm0, %v3422_v0  ;;  %v2669_v9 = vld [vmem:[%s3536_s21 + $0x20] sm:$0xff]   ;;  %v2670_v10 = vld [vmem:[%s3536_s21 + $0x28] sm:$0xff]   ;;  %v2612_v13 = vunpack.c.l.bf16 %v2667_v3  ;;  %v2613_v14 = vunpack.c.h.bf16 %v2667_v3  ;;  %v2616_v15 = vunpack.c.l.bf16 %v2668_v8  ;;  %v2617_v16 = vunpack.c.h.bf16 %v2668_v8 }
  0x15   : > { %215 = vst.msk [vmem:[#allocation2 + $0x70] sm:$0x3] %vm202_vm1, %v3422_v0  ;;  %218 = vst.msk [vmem:[#allocation2 + $0x88] sm:$0x3] %vm202_vm1, %v3422_v0  ;;  %v384_v11 = vld [vmem:[#allocation2 + $0x1] sm:$0xff]  ;;  %v2671_v17 = vld [vmem:[%s3536_s21 + $0x30] sm:$0xff]   ;;  %v2620_v19 = vunpack.c.l.bf16 %v2669_v9  ;;  %v2621_v20 = vunpack.c.h.bf16 %v2669_v9  ;;  %v2624_v21 = vunpack.c.l.bf16 %v2670_v10  ;;  %v2625_v25 = vunpack.c.h.bf16 %v2670_v10 }
  0x16   : > { %216 = vst.msk [vmem:[#allocation2 + $0x78] sm:$0xff] %vm199_vm0, %v3422_v0  ;;  %217 = vst.msk [vmem:[#allocation2 + $0x80] sm:$0xff] %vm199_vm0, %v3422_v0  ;;  %v385_v12 = vld [vmem:[#allocation2 + $0x9] sm:$0xff]  ;;  %v2672_v22 = vld [vmem:[%s3536_s21 + $0x38] sm:$0xff]   ;;  %v2628_v26 = vunpack.c.l.bf16 %v2671_v17  ;;  %v2629_v27 = vunpack.c.h.bf16 %v2671_v17  ;;  %vm1964_vm10 = vcmask 293888   ;;  %vm2416_vm11 = vcmask 60416  }
  0x17   : > { %219 = vst.msk [vmem:[#allocation2 + $0x90] sm:$0xff] %vm199_vm0, %v3422_v0  ;;  %220 = vst.msk [vmem:[#allocation2 + $0x98] sm:$0xff] %vm199_vm0, %v3422_v0  ;;  %v2763_v18 = vpack.i.bf16 %v385_v12, %v384_v11  ;;  %v2673_v23 = vld [vmem:[%s3536_s21 + $0x40] sm:$0xff]   ;;  %v2674_v24 = vld [vmem:[%s3536_s21 + $0x48] sm:$0xff]   ;;  %v2632_v28 = vunpack.c.l.bf16 %v2672_v22  ;;  %v2633_v32 = vunpack.c.h.bf16 %v2672_v22 }
  0x18   : > { %221 = vst.msk [vmem:[#allocation2 + $0xa0] sm:$0x3] %vm202_vm1, %v3422_v0  ;;  %224 = vst.msk [vmem:[#allocation2 + $0xb8] sm:$0x3] %vm202_vm1, %v3422_v0  ;;  %v2675_v29 = vld [vmem:[%s3536_s21 + $0x50] sm:$0xff]   ;;  %v2676_v30 = vld [vmem:[%s3536_s21 + $0x58] sm:$0xff]   ;;  %v2636_v33 = vunpack.c.l.bf16 %v2673_v23  ;;  %v2637_v34 = vunpack.c.h.bf16 %v2673_v23  ;;  %v2640_v35 = vunpack.c.l.bf16 %v2674_v24  ;;  %v2641_v38 = vunpack.c.h.bf16 %v2674_v24 }
  0x19   : > { %222 = vst.msk [vmem:[#allocation2 + $0xa8] sm:$0xff] %vm199_vm0, %v3422_v0  ;;  %223 = vst.msk [vmem:[#allocation2 + $0xb0] sm:$0xff] %vm199_vm0, %v3422_v0  ;;  %v2677_v31 = vld [vmem:[%s3536_s21 + $0x60] sm:$0xff]   ;;  %2764 = vrot.lane.b32.xlu0 %v2763_v18, %s3423_s22  ;;  %v2678_v36 = vld [vmem:[%s3536_s21 + $0x68] sm:$0xff]   ;;  %v2644_v39 = vunpack.c.l.bf16 %v2675_v29  ;;  %v2645_v40 = vunpack.c.h.bf16 %v2675_v29  ;;  %v2648_v41 = vunpack.c.l.bf16 %v2676_v30  ;;  %v2649_v43 = vunpack.c.h.bf16 %v2676_v30 }
  0x1a   : > { %225 = vst.msk [vmem:[#allocation2 + $0xc0] sm:$0xff] %vm199_vm0, %v3422_v0  ;;  %226 = vst.msk [vmem:[#allocation2 + $0xc8] sm:$0xff] %vm199_vm0, %v3422_v0  ;;  %v2679_v37 = vld [vmem:[%s3536_s21 + $0x70] sm:$0xff]   ;;  %v2680_v42 = vld [vmem:[%s3536_s21 + $0x78] sm:$0xff]   ;;  %v2652_v44 = vunpack.c.l.bf16 %v2677_v31  ;;  %v2653_v45 = vunpack.c.h.bf16 %v2677_v31  ;;  %v2656_v46 = vunpack.c.l.bf16 %v2678_v36  ;;  %v2657_v47 = vunpack.c.h.bf16 %v2678_v36 }
  0x1b   : > { %227 = vst.msk [vmem:[#allocation2 + $0xd0] sm:$0x3] %vm202_vm1, %v3422_v0  ;;  %230 = vst.msk [vmem:[#allocation2 + $0xe8] sm:$0x3] %vm202_vm1, %v3422_v0  ;;  %v2660_v48 = vunpack.c.l.bf16 %v2679_v37  ;;  %v2661_v49 = vunpack.c.h.bf16 %v2679_v37  ;;  %v2664_v50 = vunpack.c.l.bf16 %v2680_v42  ;;  %v2665_v51 = vunpack.c.h.bf16 %v2680_v42 }
  0x1c   : > { %228 = vst.msk [vmem:[#allocation2 + $0xd8] sm:$0xff] %vm199_vm0, %v3422_v0  ;;  %229 = vst.msk [vmem:[#allocation2 + $0xe0] sm:$0xff] %vm199_vm0, %v3422_v0 }
  0x1d   : > { %231 = vst.msk [vmem:[#allocation2 + $0xf0] sm:$0xff] %vm199_vm0, %v3422_v0  ;;  %232 = vst.msk [vmem:[#allocation2 + $0xf8] sm:$0xff] %vm199_vm0, %v3422_v0 }
  0x1e   : > { %233 = vst.msk [vmem:[#allocation2 + $0x100] sm:$0x3] %vm202_vm1, %v3422_v0  ;;  %236 = vst.msk [vmem:[#allocation2 + $0x118] sm:$0x3] %vm202_vm1, %v3422_v0 }
  0x1f   : > { %234 = vst.msk [vmem:[#allocation2 + $0x108] sm:$0xff] %vm199_vm0, %v3422_v0  ;;  %235 = vst.msk [vmem:[#allocation2 + $0x110] sm:$0xff] %vm199_vm0, %v3422_v0 }
  0x20   : > { %237 = vst.msk [vmem:[#allocation2 + $0x120] sm:$0xff] %vm199_vm0, %v3422_v0  ;;  %238 = vst.msk [vmem:[#allocation2 + $0x128] sm:$0xff] %vm199_vm0, %v3422_v0 }
  0x21   : > { %239 = vst.msk [vmem:[#allocation2 + $0x130] sm:$0x3] %vm202_vm1, %v3422_v0  ;;  %242 = vst.msk [vmem:[#allocation2 + $0x148] sm:$0x3] %vm202_vm1, %v3422_v0 }
  0x22   : > { %240 = vst.msk [vmem:[#allocation2 + $0x138] sm:$0xff] %vm199_vm0, %v3422_v0  ;;  %241 = vst.msk [vmem:[#allocation2 + $0x140] sm:$0xff] %vm199_vm0, %v3422_v0 }
  0x23   : > { %243 = vst.msk [vmem:[#allocation2 + $0x150] sm:$0xff] %vm199_vm0, %v3422_v0  ;;  %244 = vst.msk [vmem:[#allocation2 + $0x158] sm:$0xff] %vm199_vm0, %v3422_v0 }
  0x24   : > { %245 = vst.msk [vmem:[#allocation2 + $0x160] sm:$0x3] %vm202_vm1, %v3422_v0  ;;  %248 = vst.msk [vmem:[#allocation2 + $0x178] sm:$0x3] %vm202_vm1, %v3422_v0 }
  0x25   : > { %246 = vst.msk [vmem:[#allocation2 + $0x168] sm:$0xff] %vm199_vm0, %v3422_v0  ;;  %247 = vst.msk [vmem:[#allocation2 + $0x170] sm:$0xff] %vm199_vm0, %v3422_v0 }
  0x26   : > { %249 = vst.msk [vmem:[#allocation2 + $0x180] sm:$0xff] %vm199_vm0, %v3422_v0  ;;  %250 = vst.msk [vmem:[#allocation2 + $0x188] sm:$0xff] %vm199_vm0, %v3422_v0 }
  0x27   : > { %251 = vst.msk [vmem:[#allocation2 + $0x190] sm:$0x3] %vm202_vm1, %v3422_v0  ;;  %254 = vst.msk [vmem:[#allocation2 + $0x1a8] sm:$0x3] %vm202_vm1, %v3422_v0 }
  0x28   : > { %252 = vst.msk [vmem:[#allocation2 + $0x198] sm:$0xff] %vm199_vm0, %v3422_v0  ;;  %253 = vst.msk [vmem:[#allocation2 + $0x1a0] sm:$0xff] %vm199_vm0, %v3422_v0 }
  0x29   : > { %322 = vst.msk [vmem:[#allocation2 + $0x31] sm:$0xff] %vm199_vm0, %v2608_v4  ;;  %323 = vst.msk [vmem:[#allocation2 + $0x39] sm:$0xff] %vm199_vm0, %v2609_v5 }
  0x2a   : > { %320 = vst.msk [vmem:[#allocation2 + $0x19] sm:$0xff] %vm199_vm0, %v2604_v6  ;;  %321 = vst.msk [vmem:[#allocation2 + $0x21] sm:$0xff] %vm199_vm0, %v2605_v7 }
  0x2b   : > { %324 = vst.msk [vmem:[#allocation2 + $0x49] sm:$0xff] %vm199_vm0, %v2612_v13  ;;  %325 = vst.msk [vmem:[#allocation2 + $0x51] sm:$0xff] %vm199_vm0, %v2613_v14 }
  0x2c   : > { %326 = vst.msk [vmem:[#allocation2 + $0x61] sm:$0xff] %vm199_vm0, %v2616_v15  ;;  %327 = vst.msk [vmem:[#allocation2 + $0x69] sm:$0xff] %vm199_vm0, %v2617_v16 }
  0x2d   : > { %328 = vst.msk [vmem:[#allocation2 + $0x79] sm:$0xff] %vm199_vm0, %v2620_v19  ;;  %329 = vst.msk [vmem:[#allocation2 + $0x81] sm:$0xff] %vm199_vm0, %v2621_v20 }
  0x2e   : > { %330 = vst.msk [vmem:[#allocation2 + $0x91] sm:$0xff] %vm199_vm0, %v2624_v21  ;;  %331 = vst.msk [vmem:[#allocation2 + $0x99] sm:$0xff] %vm199_vm0, %v2625_v25 }
  0x2f   : > { %332 = vst.msk [vmem:[#allocation2 + $0xa9] sm:$0xff] %vm199_vm0, %v2628_v26  ;;  %333 = vst.msk [vmem:[#allocation2 + $0xb1] sm:$0xff] %vm199_vm0, %v2629_v27 }
  0x30   : > { %334 = vst.msk [vmem:[#allocation2 + $0xc1] sm:$0xff] %vm199_vm0, %v2632_v28  ;;  %335 = vst.msk [vmem:[#allocation2 + $0xc9] sm:$0xff] %vm199_vm0, %v2633_v32  ;;  %v388_v52 = vld [vmem:[#allocation2 + $0x31] sm:$0xff]  ;;  %v389_v53 = vld [vmem:[#allocation2 + $0x39] sm:$0xff] }
  0x31   : > { %336 = vst.msk [vmem:[#allocation2 + $0xd9] sm:$0xff] %vm199_vm0, %v2636_v33  ;;  %337 = vst.msk [vmem:[#allocation2 + $0xe1] sm:$0xff] %vm199_vm0, %v2637_v34  ;;  %v386_v54 = vld [vmem:[#allocation2 + $0x19] sm:$0xff]  ;;  %v3585_v55 = vpack.i.bf16 %v389_v53, %v388_v52  ;;  %v387_v56 = vld [vmem:[#allocation2 + $0x21] sm:$0xff] }
  0x32   : > { %338 = vst.msk [vmem:[#allocation2 + $0xf1] sm:$0xff] %vm199_vm0, %v2640_v35  ;;  %339 = vst.msk [vmem:[#allocation2 + $0xf9] sm:$0xff] %vm199_vm0, %v2641_v38  ;;  %v390_v57 = vld [vmem:[#allocation2 + $0x49] sm:$0xff]  ;;  %v391_v58 = vld [vmem:[#allocation2 + $0x51] sm:$0xff]  ;;  %v3589_v59 = vpack.i.bf16 %v387_v56, %v386_v54 }
  0x33   : > { %340 = vst.msk [vmem:[#allocation2 + $0x109] sm:$0xff] %vm199_vm0, %v2644_v39  ;;  %341 = vst.msk [vmem:[#allocation2 + $0x111] sm:$0xff] %vm199_vm0, %v2645_v40  ;;  %v392_v60 = vld [vmem:[#allocation2 + $0x61] sm:$0xff]  ;;  %v393_v61 = vld [vmem:[#allocation2 + $0x69] sm:$0xff]  ;;  %2774 = vrot.lane.b32.xlu1 %v3585_v55, %s3423_s22  ;;  %v3593_v62 = vpack.i.bf16 %v391_v58, %v390_v57 }
  0x34   : > { %342 = vst.msk [vmem:[#allocation2 + $0x121] sm:$0xff] %vm199_vm0, %v2648_v41  ;;  %343 = vst.msk [vmem:[#allocation2 + $0x129] sm:$0xff] %vm199_vm0, %v2649_v43  ;;  %2769 = vrot.lane.b32.xlu0 %v3589_v59, %s3423_s22  ;;  %v3597_v63 = vpack.i.bf16 %v393_v61, %v392_v60  ;;  %v394_v0 = vld [vmem:[#allocation2 + $0x79] sm:$0xff]  ;;  %v395_v1 = vld [vmem:[#allocation2 + $0x81] sm:$0xff] }
  0x35   : > { %344 = vst.msk [vmem:[#allocation2 + $0x139] sm:$0xff] %vm199_vm0, %v2652_v44  ;;  %345 = vst.msk [vmem:[#allocation2 + $0x141] sm:$0xff] %vm199_vm0, %v2653_v45  ;;  %v396_v2 = vld [vmem:[#allocation2 + $0x91] sm:$0xff]  ;;  %v397_v3 = vld [vmem:[#allocation2 + $0x99] sm:$0xff]  ;;  %v2788_v4 = vpack.i.bf16 %v395_v1, %v394_v0 }
  0x36   : > { %346 = vst.msk [vmem:[#allocation2 + $0x151] sm:$0xff] %vm199_vm0, %v2656_v46  ;;  %347 = vst.msk [vmem:[#allocation2 + $0x159] sm:$0xff] %vm199_vm0, %v2657_v47  ;;  %v2793_v5 = vpack.i.bf16 %v397_v3, %v396_v2  ;;  %v398_v6 = vld [vmem:[#allocation2 + $0xa9] sm:$0xff]  ;;  %v399_v7 = vld [vmem:[#allocation2 + $0xb1] sm:$0xff] }
  0x37   : > { %348 = vst.msk [vmem:[#allocation2 + $0x169] sm:$0xff] %vm199_vm0, %v2660_v48  ;;  %349 = vst.msk [vmem:[#allocation2 + $0x171] sm:$0xff] %vm199_vm0, %v2661_v49  ;;  %2779 = vrot.lane.b32.xlu1 %v3593_v62, %s3423_s22  ;;  %v400_v8 = vld [vmem:[#allocation2 + $0xc1] sm:$0xff]  ;;  %v401_v9 = vld [vmem:[#allocation2 + $0xc9] sm:$0xff]  ;;  %v2798_v10 = vpack.i.bf16 %v399_v7, %v398_v6 }
  0x38   : > { %350 = vst.msk [vmem:[#allocation2 + $0x181] sm:$0xff] %vm199_vm0, %v2664_v50  ;;  %351 = vst.msk [vmem:[#allocation2 + $0x189] sm:$0xff] %vm199_vm0, %v2665_v51  ;;  %2784 = vrot.lane.b32.xlu0 %v3597_v63, %s3423_s22  ;;  %v2803_v11 = vpack.i.bf16 %v401_v9, %v400_v8  ;;  %v402_v12 = vld [vmem:[#allocation2 + $0xd9] sm:$0xff]  ;;  %v403_v13 = vld [vmem:[#allocation2 + $0xe1] sm:$0xff] }
  0x39   : > { %v404_v14 = vld [vmem:[#allocation2 + $0xf1] sm:$0xff]  ;;  %v405_v15 = vld [vmem:[#allocation2 + $0xf9] sm:$0xff]  ;;  %v3606_v16 = vpack.i.bf16 %v403_v13, %v402_v12  ;;  %v416_v32 = vld [vmem:[#allocation2 + $0x2] sm:$0xff] }
  0x3a   : > { %v3609_v17 = vpack.i.bf16 %v405_v15, %v404_v14  ;;  %v406_v18 = vld [vmem:[#allocation2 + $0x109] sm:$0xff]  ;;  %v407_v19 = vld [vmem:[#allocation2 + $0x111] sm:$0xff]  ;;  %v418_v36 = vld [vmem:[#allocation2 + $0x1a] sm:$0xff] }
  0x3b   : > { %2789 = vrot.lane.b32.xlu1 %v2788_v4, %s3423_s22  ;;  %v408_v20 = vld [vmem:[#allocation2 + $0x121] sm:$0xff]  ;;  %v409_v21 = vld [vmem:[#allocation2 + $0x129] sm:$0xff]  ;;  %v3613_v22 = vpack.i.bf16 %v407_v19, %v406_v18  ;;  %v420_v38 = vld [vmem:[#allocation2 + $0x32] sm:$0xff] }
  0x3c   : > { %2794 = vrot.lane.b32.xlu0 %v2793_v5, %s3423_s22  ;;  %v3617_v23 = vpack.i.bf16 %v409_v21, %v408_v20  ;;  %v410_v24 = vld [vmem:[#allocation2 + $0x139] sm:$0xff]  ;;  %v411_v25 = vld [vmem:[#allocation2 + $0x141] sm:$0xff]  ;;  %v417_v33 = vld [vmem:[#allocation2 + $0xa] sm:$0xff] }
  0x3d   : > { %v412_v26 = vld [vmem:[#allocation2 + $0x151] sm:$0xff]  ;;  %v413_v27 = vld [vmem:[#allocation2 + $0x159] sm:$0xff]  ;;  %v3621_v28 = vpack.i.bf16 %v411_v25, %v410_v24  ;;  %v2843_v35 = vpack.i.bf16 %v417_v33, %v416_v32  ;;  %v419_v37 = vld [vmem:[#allocation2 + $0x22] sm:$0xff] }
  0x3e   : > { %v2833_v29 = vpack.i.bf16 %v413_v27, %v412_v26  ;;  %v414_v30 = vld [vmem:[#allocation2 + $0x169] sm:$0xff]  ;;  %v415_v31 = vld [vmem:[#allocation2 + $0x171] sm:$0xff]  ;;  %v421_v39 = vld [vmem:[#allocation2 + $0x3a] sm:$0xff]  ;;  %v3629_v40 = vpack.i.bf16 %v419_v37, %v418_v36 }
  0x3f   : > { %2799 = vrot.lane.b32.xlu1 %v2798_v10, %s3423_s22  ;;  %v2838_v34 = vpack.i.bf16 %v415_v31, %v414_v30  ;;  %v3632_v41 = vpack.i.bf16 %v421_v39, %v420_v38  ;;  %v422_v42 = vld [vmem:[#allocation2 + $0x4a] sm:$0xff]  ;;  %v423_v43 = vld [vmem:[#allocation2 + $0x52] sm:$0xff]  ;;  %v424_v44 = vld [vmem:[#allocation2 + $0x62] sm:$0xff] }
  0x40   : > { %2804 = vrot.lane.b32.xlu0 %v2803_v11, %s3423_s22  ;;  %v425_v45 = vld [vmem:[#allocation2 + $0x6a] sm:$0xff]  ;;  %v3636_v46 = vpack.i.bf16 %v423_v43, %v422_v42  ;;  %v426_v48 = vld [vmem:[#allocation2 + $0x7a] sm:$0xff]  ;;  %v427_v49 = vld [vmem:[#allocation2 + $0x82] sm:$0xff] }
  0x41   : > { %v3640_v47 = vpack.i.bf16 %v425_v45, %v424_v44  ;;  %v428_v50 = vld [vmem:[#allocation2 + $0x92] sm:$0xff]  ;;  %v429_v51 = vld [vmem:[#allocation2 + $0x9a] sm:$0xff]  ;;  %v3644_v52 = vpack.i.bf16 %v427_v49, %v426_v48  ;;  %v430_v54 = vld [vmem:[#allocation2 + $0xaa] sm:$0xff] }
  0x42   : > { %v2873_v53 = vpack.i.bf16 %v429_v51, %v428_v50  ;;  %v431_v56 = vld [vmem:[#allocation2 + $0xb2] sm:$0xff]  ;;  %v432_v57 = vld [vmem:[#allocation2 + $0xc2] sm:$0xff]  ;;  %v433_v58 = vld [vmem:[#allocation2 + $0xca] sm:$0xff] }
  0x43   : > { %2809 = vrot.lane.b32.xlu1 %v3606_v16, %s3423_s22  ;;  %v2878_v60 = vpack.i.bf16 %v431_v56, %v430_v54  ;;  %v2883_v61 = vpack.i.bf16 %v433_v58, %v432_v57  ;;  %v434_v0 = vld [vmem:[#allocation2 + $0xda] sm:$0xff]  ;;  %v435_v1 = vld [vmem:[#allocation2 + $0xe2] sm:$0xff]  ;;  %v436_v2 = vld [vmem:[#allocation2 + $0xf2] sm:$0xff] }
  0x44   : > { %2814 = vrot.lane.b32.xlu0 %v3609_v17, %s3423_s22  ;;  %v437_v3 = vld [vmem:[#allocation2 + $0xfa] sm:$0xff]  ;;  %v3652_v4 = vpack.i.bf16 %v435_v1, %v434_v0  ;;  %v438_v6 = vld [vmem:[#allocation2 + $0x10a] sm:$0xff]  ;;  %v439_v7 = vld [vmem:[#allocation2 + $0x112] sm:$0xff] }
  0x45   : > { %v3655_v5 = vpack.i.bf16 %v437_v3, %v436_v2  ;;  %v440_v8 = vld [vmem:[#allocation2 + $0x122] sm:$0xff]  ;;  %v441_v9 = vld [vmem:[#allocation2 + $0x12a] sm:$0xff]  ;;  %v3659_v10 = vpack.i.bf16 %v439_v7, %v438_v6  ;;  %v442_v12 = vld [vmem:[#allocation2 + $0x13a] sm:$0xff] }
  0x46   : > { %v3663_v11 = vpack.i.bf16 %v441_v9, %v440_v8  ;;  %v443_v13 = vld [vmem:[#allocation2 + $0x142] sm:$0xff]  ;;  %v444_v14 = vld [vmem:[#allocation2 + $0x152] sm:$0xff]  ;;  %v445_v15 = vld [vmem:[#allocation2 + $0x15a] sm:$0xff] }
  0x47   : > { %2819 = vrot.lane.b32.xlu1 %v3613_v22, %s3423_s22  ;;  %v3667_v18 = vpack.i.bf16 %v443_v13, %v442_v12  ;;  %v3671_v19 = vpack.i.bf16 %v445_v15, %v444_v14  ;;  %v446_v20 = vld [vmem:[#allocation2 + $0x16a] sm:$0xff]  ;;  %v447_v21 = vld [vmem:[#allocation2 + $0x172] sm:$0xff]  ;;  %v3675_v25 = vld [vmem:[#allocation2 + $0x20] sm:$0xff] }
  0x48   : > { %2824 = vrot.lane.b32.xlu0 %v3617_v23, %s3423_s22  ;;  %v3673_v24 = vld [vmem:[#allocation2 + $0x18] sm:$0xff]  ;;  %v2918_v26 = vpack.i.bf16 %v447_v21, %v446_v20  ;;  %v452_v31 = vld [vmem:[#allocation2 + $0x48] sm:$0xff]  ;;  %v453_v32 = vld [vmem:[#allocation2 + $0x50] sm:$0xff] }
  0x49   : > { %v2923_v27 = vpack.i.bf16 %v3675_v25, %v3673_v24  ;;  %v451_v30 = vld [vmem:[#allocation2 + $0x38] sm:$0xff]  ;;  %v3691_v36 = vld [vmem:[#allocation2 + $0x68] sm:$0xff]  ;;  %v3695_v38 = vld [vmem:[#allocation2 + $0x80] sm:$0xff] }
  0x4a   : > { %v3693_v37 = vld [vmem:[#allocation2 + $0x78] sm:$0xff]  ;;  %v3709_v43 = vld [vmem:[#allocation2 + $0x90] sm:$0xff]  ;;  %v3713_v45 = vld [vmem:[#allocation2 + $0xa8] sm:$0xff] }
  0x4b   : > { %2829 = vrot.lane.b32.xlu1 %v3621_v28, %s3423_s22  ;;  %v3707_v42 = vpack.i.bf16 %v3695_v38, %v3693_v37  ;;  %v3711_v44 = vld [vmem:[#allocation2 + $0x98] sm:$0xff]  ;;  %v3715_v48 = vld [vmem:[#allocation2 + $0xb0] sm:$0xff]  ;;  %v3729_v51 = vld [vmem:[#allocation2 + $0xc0] sm:$0xff] }
  0x4c   : > { %2834 = vrot.lane.b32.xlu0 %v2833_v29, %s3423_s22  ;;  %v450_v29 = vld [vmem:[#allocation2 + $0x30] sm:$0xff]  ;;  %v3721_v49 = vpack.i.bf16 %v3711_v44, %v3709_v43  ;;  %v3727_v50 = vpack.i.bf16 %v3715_v48, %v3713_v45  ;;  %4794 = vst [vmem:[#allocation3_spill] sm:$0xff] %v3729_v51  ;;  %v3733_v54 = vld [vmem:[#allocation2 + $0xd8] sm:$0xff]  ;;  %v3735_v56 = vld [vmem:[#allocation2 + $0xe0] sm:$0xff] }
  0x4d   : > { %v3684_v33 = vpack.i.bf16 %v451_v30, %v450_v29  ;;  %4796 = vst [vmem:[#allocation5_spill] sm:$0xff] %v3733_v54  ;;  %4797 = vst [vmem:[#allocation6_spill] sm:$0xff] %v3735_v56  ;;  %v2963_v58 = vpack.i.bf16 %v3735_v56, %v3733_v54  ;;  %v468_v0 = vld [vmem:[#allocation2 + $0x108] sm:$0xff]  ;;  %v469_v1 = vld [vmem:[#allocation2 + $0x110] sm:$0xff] }
  0x4e   : > { %v2973_v3 = vpack.i.bf16 %v469_v1, %v468_v0  ;;  %v3747_v6 = vld [vmem:[#allocation2 + $0x120] sm:$0xff]  ;;  %v3749_v7 = vld [vmem:[#allocation2 + $0x128] sm:$0xff]  ;;  %v3751_v8 = vld [vmem:[#allocation2 + $0x138] sm:$0xff] }
  0x4f   : > { %2839 = vrot.lane.b32.xlu1 %v2838_v34, %s3423_s22  ;;  %v3687_v34 = vpack.i.bf16 %v453_v32, %v452_v31  ;;  %v3753_v9 = vld [vmem:[#allocation2 + $0x140] sm:$0xff]  ;;  %v3758_v12 = vpack.i.bf16 %v3749_v7, %v3747_v6  ;;  %v3765_v14 = vld [vmem:[#allocation2 + $0x150] sm:$0xff]  ;;  %v3767_v15 = vld [vmem:[#allocation2 + $0x158] sm:$0xff] }
  0x50   : > { %2844 = vrot.lane.b32.xlu0 %v2843_v35, %s3424_s23  ;;  %v3689_v35 = vld [vmem:[#allocation2 + $0x60] sm:$0xff]  ;;  %v3763_v13 = vpack.i.bf16 %v3753_v9, %v3751_v8  ;;  %v3769_v20 = vld [vmem:[#allocation2 + $0x168] sm:$0xff]  ;;  %v3771_v21 = vld [vmem:[#allocation2 + $0x170] sm:$0xff] }
  0x51   : > { %v3701_v39 = vpack.i.bf16 %v3691_v36, %v3689_v35  ;;  %v478_v29 = vld [vmem:[#allocation2 + $0x180] sm:$0xff]  ;;  %v479_v30 = vld [vmem:[#allocation2 + $0x188] sm:$0xff] }
  0x52   : > { %v2998_v31 = vpack.i.bf16 %v479_v30, %v478_v29  ;;  %v581_v30 = vld [vmem:[#allocation2 + $0x61] sm:$0xff] }
  0x53   : > { %2849 = vrot.lane.b32.xlu1 %v3629_v40, %s3424_s23 }
  0x54   : > { %2854 = vrot.lane.b32.xlu0 %v3632_v41, %s3424_s23 }
  0x57   : > { %2859 = vrot.lane.b32.xlu1 %v3636_v46, %s3424_s23 }
  0x58   : > { %2864 = vrot.lane.b32.xlu0 %v3640_v47, %s3424_s23 }
  0x5b   : > { %2869 = vrot.lane.b32.xlu1 %v3644_v52, %s3424_s23 }
  0x5c   : > { %2874 = vrot.lane.b32.xlu0 %v2873_v53, %s3424_s23  ;;  %v3731_v53 = vld [vmem:[#allocation2 + $0xc8] sm:$0xff] }
  0x5d   : > { %4795 = vst [vmem:[#allocation4_spill] sm:$0xff] %v3731_v53  ;;  %v2958_v57 = vpack.i.bf16 %v3731_v53, %v3729_v51 }
  0x5f   : > { %2879 = vrot.lane.b32.xlu1 %v2878_v60, %s3424_s23  ;;  %v466_v60 = vld [vmem:[#allocation2 + $0xf0] sm:$0xff] }
  0x60   : > { %2884 = vrot.lane.b32.xlu0 %v2883_v61, %s3424_s23  ;;  %v467_v61 = vld [vmem:[#allocation2 + $0xf8] sm:$0xff] }
  0x61   : > { %v2968_v2 = vpack.i.bf16 %v467_v61, %v466_v60 }
  0x63   : > { %2889 = vrot.lane.b32.xlu1 %v3652_v4, %s3424_s23 }
  0x64   : > { %2894 = vrot.lane.b32.xlu0 %v3655_v5, %s3424_s23 }
  0x67   : > { %2899 = vrot.lane.b32.xlu1 %v3659_v10, %s3424_s23 }
  0x68   : > { %2904 = vrot.lane.b32.xlu0 %v3663_v11, %s3424_s23 }
  0x6b   : > { %2909 = vrot.lane.b32.xlu1 %v3667_v18, %s3424_s23 }
  0x6c   : > { %2914 = vrot.lane.b32.xlu0 %v3671_v19, %s3424_s23 }
  0x6f   : > { %2919 = vrot.lane.b32.xlu1 %v2918_v26, %s3424_s23  ;;  %v3777_v26 = vpack.i.bf16 %v3767_v15, %v3765_v14 }
  0x70   : > { %2924 = vrot.lane.b32.xlu0 %v2923_v27, %s3425_s24  ;;  %v3783_v27 = vpack.i.bf16 %v3771_v21, %v3769_v20 }
  0x73   : > { %2929 = vrot.lane.b32.xlu1 %v3684_v33, %s3425_s24 }
  0x74   : > { %2934 = vrot.lane.b32.xlu0 %v3687_v34, %s3425_s24 }
  0x77   : > { %2939 = vrot.lane.b32.xlu1 %v3701_v39, %s3425_s24 }
  0x78   : > { %2944 = vrot.lane.b32.xlu0 %v3707_v42, %s3425_s24 }
  0x7b   : > { %2949 = vrot.lane.b32.xlu1 %v3721_v49, %s3425_s24 }
  0x7c   : > { %2954 = vrot.lane.b32.xlu0 %v3727_v50, %s3425_s24 }
  0x7f   : > { %2959 = vrot.lane.b32.xlu1 %v2958_v57, %s3425_s24 }
  0x80   : > { %2964 = vrot.lane.b32.xlu0 %v2963_v58, %s3425_s24 }
  0x83   : > { %2969 = vrot.lane.b32.xlu1 %v2968_v2, %s3425_s24 }
  0x84   : > { %2974 = vrot.lane.b32.xlu0 %v2973_v3, %s3425_s24 }
  0x87   : > { %2979 = vrot.lane.b32.xlu1 %v3758_v12, %s3425_s24 }
  0x88   : > { %2984 = vrot.lane.b32.xlu0 %v3763_v13, %s3425_s24 }
  0x8b   : > { %2989 = vrot.lane.b32.xlu1 %v3777_v26, %s3425_s24 }
  0x8c   : > { %2994 = vrot.lane.b32.xlu0 %v3783_v27, %s3425_s24 }
  0x8f   : > { %2999 = vrot.lane.b32.xlu1 %v2998_v31, %s3425_s24  ;;  %v582_v31 = vld [vmem:[#allocation2 + $0x69] sm:$0xff] }
  0x90   : > { %3004 = vrot.lane.b32.xlu0 %v3589_v59, %s3426_s25  ;;  %v3403_v59 = vld [vmem:[%s4776_s1] sm:$0xff]  }
  0x91   : > { %2700 = vmatprep.subr.bf16.mxu0 %v3403_v59  ;;  %2738 = vmatprep.subr.bf16.mxu1 %v3403_v59 }
  0x92   : > { %2701 = vmatpush3.bf16.msra.mxu0 %v3403_v59  ;;  %2741 = vmatpush3.bf16.msra.mxu1 %v3403_v59 }
  0x93   : > { %3009 = vrot.lane.b32.xlu1 %v3585_v55, %s3426_s25 }
  0x94   : > { %3014 = vrot.lane.b32.xlu0 %v3606_v16, %s3426_s25  ;;  %v3811_v16 = vpop.permute.xlu0 %2764 }
  0x97   : > { %3019 = vrot.lane.b32.xlu1 %v3609_v17, %s3426_s25 }
  0x98   : > { %3024 = vrot.lane.b32.xlu0 %v3629_v40, %s3427_s26  ;;  %v3404_v40 = vld [vmem:[%s4776_s1 + $0x8] sm:$0xff]  }
  0x99   : > { %2702 = vmatprep.subr.bf16.mxu0 %v3404_v40  ;;  %2739 = vmatprep.subr.bf16.mxu1 %v3404_v40 }
  0x9a   : > { %2703 = vmatpush3.bf16.msra.mxu0 %v3404_v40  ;;  %2742 = vmatpush3.bf16.msra.mxu1 %v3404_v40 }
  0x9b   : > { %3029 = vrot.lane.b32.xlu1 %v3652_v4, %s3427_s26 }
  0x9c   : > { %3034 = vrot.lane.b32.xlu0 %v3632_v41, %s3427_s26 }
  0x9f   : > { %3039 = vrot.lane.b32.xlu1 %v3655_v5, %s3427_s26 }
  0xa0   : > { %3044 = vrot.lane.b32.xlu0 %v3684_v33, %s3428_s29  ;;  %v3405_v33 = vld [vmem:[%s4776_s1 + $0x10] ss:$0 sps:$4 sm:$0x33]  }
  0xa1   : > { %2744 = vmatprep.subr.msk.bf16.mxu0 %vm2013_vm2, %v3405_v33  ;;  %2745 = vmatprep.subr.msk.bf16.mxu1 %vm2013_vm2, %v3405_v33 }
  0xa3   : > { %3049 = vrot.lane.b32.xlu1 %v2968_v2, %s3428_s29 }
  0xa4   : > { %3054 = vrot.lane.b32.xlu0 %v3687_v34, %s3428_s29  ;;  %v2015_v34 = vsel %vm2013_vm2, %v3405_v33, 0  ;;  %v583_v33 = vld [vmem:[#allocation2 + $0x79] sm:$0xff] }
  0xa5   : > { %v3819_v4 = vpop.permute.xlu1 %2774  ;;  %2705 = vmatpush3.bf16.msra.mxu0 %v2015_v34  ;;  %2743 = vmatpush3.bf16.msra.mxu1 %v2015_v34  ;;  %v584_v34 = vld [vmem:[#allocation2 + $0x81] sm:$0xff] }
  0xa6   : > { %4798 = vst [vmem:[#allocation7_spill] sm:$0xff] %v3819_v4  ;;  %v3821_v32 = vpop.permute.xlu0 %2769 }
  0xa7   : > { %3059 = vrot.lane.b32.xlu1 %v2973_v3, %s3428_s29 }
  0xa8   : > { %3064 = vrot.lane.b32.xlu0 %v3585_v55, %s3429_s8 }
  0xa9   : > { %v3829_v57 = vpop.permute.xlu1 %2779 }
  0xaa   : > { %4799 = vst [vmem:[#allocation8_spill] sm:$0xff] %v3829_v57  ;;  %v3831_v58 = vpop.permute.xlu0 %2784 }
  0xab   : > { %3069 = vrot.lane.b32.xlu1 %v3609_v17, %s3429_s8 }
  0xac   : > { %3074 = vrot.lane.b32.xlu0 %v3593_v62, %s3429_s8 }
  0xad   : > { %v3837_v60 = vpop.permute.xlu1 %2789 }
  0xae   : > { %v3839_v61 = vpop.permute.xlu0 %2794 }
  0xaf   : > { %3079 = vrot.lane.b32.xlu1 %v3613_v22, %s3429_s8 }
  0xb0   : > { %3084 = vrot.lane.b32.xlu0 %v3632_v41, %s3430_s9 }
  0xb1   : > { %v3845_v55 = vpop.permute.xlu1 %2799 }
  0xb2   : > { %v3847_v0 = vpop.permute.xlu0 %2804 }
  0xb3   : > { %3089 = vrot.lane.b32.xlu1 %v3655_v5, %s3430_s9 }
  0xb4   : > { %3094 = vrot.lane.b32.xlu0 %v3636_v46, %s3430_s9 }
  0xb5   : > { %v3853_v17 = vpop.permute.xlu1 %2809 }
  0xb6   : > { %v3855_v1 = vpop.permute.xlu0 %2814 }
  0xb7   : > { %4800 = vst [vmem:[#allocation9_spill] sm:$0xff] %v3855_v1  ;;  %3099 = vrot.lane.b32.xlu1 %v3659_v10, %s3430_s9 }
  0xb8   : > { %3104 = vrot.lane.b32.xlu0 %v3593_v62, %s3426_s25 }
  0xb9   : > { %v3861_v41 = vpop.permute.xlu1 %2819 }
  0xba   : > { %4801 = vst [vmem:[#allocation10_spill] sm:$0xff] %v3861_v41  ;;  %v3863_v2 = vpop.permute.xlu0 %2824 }
  0xbb   : > { %3109 = vrot.lane.b32.xlu1 %v3613_v22, %s3426_s25 }
  0xbc   : > { %3114 = vrot.lane.b32.xlu0 %v3597_v63, %s3426_s25 }
  0xbd   : > { %v3869_v5 = vpop.permute.xlu1 %2829 }
  0xbe   : > { %v2835_v3 = vpop.permute.xlu0 %2834 }
  0xbf   : > { %3119 = vrot.lane.b32.xlu1 %v3617_v23, %s3426_s25 }
  0xc0   : > { %3124 = vrot.lane.b32.xlu0 %v3636_v46, %s3427_s26 }
  0xc1   : > { %v3875_v62 = vpop.permute.xlu1 %2839 }
  0xc2   : > { %v3877_v29 = vpop.permute.xlu0 %2844  ;;  %v2841_v57 = vunpack.i.l.bf16 %v3875_v62 }
  0xc3   : > { %3129 = vrot.lane.b32.xlu1 %v3659_v10, %s3427_s26  ;;  %v3163_v10 = vpack.i.bf16 %v582_v31, %v581_v30  ;;  %v505_v31 = vld [vmem:[#allocation2 + $0x141] sm:$0xff] }
  0xc4   : > { %3134 = vrot.lane.b32.xlu0 %v3640_v47, %s3427_s26 }
  0xc5   : > { %v3883_v63 = vpop.permute.xlu1 %2849 }
  0xc6   : > { %v3885_v22 = vpop.permute.xlu0 %2854 }
  0xc7   : > { %4802 = vst [vmem:[#allocation11_spill] sm:$0xff] %v3885_v22  ;;  %3139 = vrot.lane.b32.xlu1 %v3663_v11, %s3427_s26 }
  0xc8   : > { %3144 = vrot.lane.b32.xlu0 %v3701_v39, %s3428_s29  ;;  %v3173_v39 = vpack.i.bf16 %v584_v34, %v583_v33  ;;  %v2836_v33 = vunpack.i.l.bf16 %v2835_v3 }
  0xc9   : > { %v3891_v46 = vpop.permute.xlu1 %2859 }
  0xca   : > { %4803 = vst [vmem:[#allocation12_spill] sm:$0xff] %v3891_v46  ;;  %v3893_v59 = vpop.permute.xlu0 %2864 }
  0xcb   : > { %3149 = vrot.lane.b32.xlu1 %v3758_v12, %s3428_s29 }
  0xcc   : > { %3154 = vrot.lane.b32.xlu0 %v3707_v42, %s3428_s29 }
  0xcd   : > { %v3899_v40 = vpop.permute.xlu1 %2869 }
  0xce   : > { %v3901_v22 = vpop.permute.xlu0 %2874 }
  0xcf   : > { %3159 = vrot.lane.b32.xlu1 %v3763_v13, %s3428_s29 }
  0xd0   : > { %3164 = vrot.lane.b32.xlu0 %v3163_v10, %s3429_s8  ;;  %v2837_v10 = vunpack.i.h.bf16 %v2835_v3  ;;  %v1693_v3 = vsel %vm199_vm0, %v3765_v14, %v2836_v33  ;;  %v2791_v33 = vunpack.i.l.bf16 %v3837_v60 }
  0xd1   : > { %v3906_v46 = vpop.permute.xlu1 %2879 }
  0xd2   : > { %v3908_v41 = vpop.permute.xlu0 %2884 }
  0xd3   : > { %3169 = vrot.lane.b32.xlu1 %v3617_v23, %s3429_s8  ;;  %v504_v23 = vld [vmem:[#allocation2 + $0x139] sm:$0xff] }
  0xd4   : > { %3174 = vrot.lane.b32.xlu0 %v3173_v39, %s3429_s8 }
  0xd5   : > { %v3913_v42 = vpop.permute.xlu1 %2889 }
  0xd6   : > { %4804 = vst [vmem:[#allocation13_spill] sm:$0xff] %v3913_v42  ;;  %v3915_v12 = vpop.permute.xlu0 %2894 }
  0xd7   : > { %4805 = vst [vmem:[#allocation14_spill] sm:$0xff] %v3915_v12  ;;  %3179 = vrot.lane.b32.xlu1 %v3621_v28, %s3429_s8  ;;  %v490_v28 = vld [vmem:[#allocation2 + $0x91] sm:$0xff]  ;;  %v491_v12 = vld [vmem:[#allocation2 + $0x99] sm:$0xff] }
  0xd8   : > { %3184 = vrot.lane.b32.xlu0 %v3640_v47, %s3430_s9  ;;  %v3208_v47 = vpack.i.bf16 %v505_v31, %v504_v23  ;;  %v3940_v54 = vpack.i.bf16 %v491_v12, %v490_v28  ;;  %v506_v23 = vld [vmem:[#allocation2 + $0x151] sm:$0xff]  ;;  %v507_v31 = vld [vmem:[#allocation2 + $0x159] sm:$0xff]  ;;  %v2796_v28 = vunpack.i.l.bf16 %v3839_v61 }
  0xd9   : > { %v3921_v13 = vpop.permute.xlu1 %2899  ;;  %v3955_v12 = vpack.i.bf16 %v507_v31, %v506_v23  ;;  %v2872_v31 = vunpack.i.h.bf16 %v3899_v40 }
  0xda   : > { %4806 = vst [vmem:[#allocation15_spill] sm:$0xff] %v3921_v13  ;;  %v3923_v30 = vpop.permute.xlu0 %2904  ;;  %v2842_v13 = vunpack.i.h.bf16 %v3875_v62 }
  0xdb   : > { %3189 = vrot.lane.b32.xlu1 %v3663_v11, %s3430_s9  ;;  %v1694_v11 = vsel %vm199_vm0, %v3767_v15, %v2837_v10  ;;  %v2792_v10 = vunpack.i.h.bf16 %v3837_v60 }
  0xdc   : > { %3194 = vrot.lane.b32.xlu0 %v3644_v52, %s3430_s9  ;;  %v1696_v14 = vsel %vm199_vm0, %v3771_v21, %v2842_v13  ;;  %v2786_v21 = vunpack.i.l.bf16 %v3831_v58 }
  0xdd   : > { %v3929_v34 = vpop.permute.xlu1 %2909  ;;  %v1676_v23 = vsel %vm199_vm0, %v3695_v38, %v2792_v10 }
  0xde   : > { %v2915_v1 = vpop.permute.xlu0 %2914  ;;  %v1709_v10 = vsel %vm1697_vm3, %v1676_v23, %v2872_v31 }
  0xdf   : > { %v2917_v4 = vunpack.i.h.bf16 %v2915_v1  ;;  %v2916_v42 = vunpack.i.l.bf16 %v2915_v1  ;;  %3199 = vrot.lane.b32.xlu1 %v3667_v18, %s3430_s9 }
  0xe0   : > { %3204 = vrot.lane.b32.xlu0 %v3173_v39, %s3426_s25  ;;  %v1695_v39 = vsel %vm199_vm0, %v3769_v20, %v2841_v57  ;;  %v522_v20 = vld [vmem:[#allocation2 + $0x92] sm:$0xff]  ;;  %v523_v57 = vld [vmem:[#allocation2 + $0x9a] sm:$0xff] }
  0xe1   : > { %v3943_v62 = vsel %vm1697_vm3, %v1693_v3, %v2916_v42  ;;  %v3946_v1 = vsel %vm1697_vm3, %v1694_v11, %v2917_v4  ;;  %v2920_v56 = vpop.permute.xlu1 %2919  ;;  %v3981_v11 = vpack.i.bf16 %v523_v57, %v522_v20  ;;  %v1673_v3 = vsel %vm199_vm0, %v3689_v35, %v2786_v21 }
  0xe2   : > { %v2922_v51 = vunpack.i.h.bf16 %v2920_v56  ;;  %v2921_v53 = vunpack.i.l.bf16 %v2920_v56  ;;  %v3948_v15 = vpop.permute.xlu0 %2924  ;;  %v2787_v56 = vunpack.i.h.bf16 %v3831_v58  ;;  %v2866_v58 = vunpack.i.l.bf16 %v3893_v59 }
  0xe3   : > { %3209 = vrot.lane.b32.xlu1 %v3208_v47, %s3426_s25  ;;  %v2867_v47 = vunpack.i.h.bf16 %v3893_v59  ;;  %v1675_v59 = vsel %vm199_vm0, %v3693_v37, %v2791_v33  ;;  %v1677_v35 = vsel %vm199_vm0, %v3709_v43, %v2796_v28  ;;  %v2877_v21 = vunpack.i.h.bf16 %v3901_v22 }
  0xe4   : > { %v3958_v42 = vsel %vm1697_vm3, %v1696_v14, %v2922_v51  ;;  %v3961_v4 = vsel %vm1697_vm3, %v1695_v39, %v2921_v53  ;;  %3214 = vrot.lane.b32.xlu0 %v3940_v54, %s3426_s25  ;;  %v2797_v53 = vunpack.i.h.bf16 %v3839_v61  ;;  %v1674_v60 = vsel %vm199_vm0, %v3691_v36, %v2787_v56 }
  0xe5   : > { %v3967_v13 = vpop.permute.xlu1 %2929  ;;  %v1706_v38 = vsel %vm1697_vm3, %v1673_v3, %v2866_v58  ;;  %v1707_v37 = vsel %vm1697_vm3, %v1674_v60, %v2867_v47  ;;  %v2801_v43 = vunpack.i.l.bf16 %v3845_v55  ;;  %v2882_v47 = vunpack.i.h.bf16 %v3906_v46 }
  0xe6   : > { %v3971_v51 = vpop.permute.xlu0 %2934  ;;  %v1678_v36 = vsel %vm199_vm0, %v3711_v44, %v2797_v53  ;;  %v2802_v44 = vunpack.i.h.bf16 %v3845_v55  ;;  %v2881_v58 = vunpack.i.l.bf16 %v3906_v46 }
  0xe7   : > { %3219 = vrot.lane.b32.xlu1 %v3955_v12, %s3426_s25 }
  0xe8   : > { %3224 = vrot.lane.b32.xlu0 %v3644_v52, %s3427_s26  ;;  %v2871_v52 = vunpack.i.l.bf16 %v3899_v40  ;;  %v2876_v40 = vunpack.i.l.bf16 %v3901_v22 }
  0xe9   : > { %v3987_v61 = vpop.permute.xlu1 %2939 }
  0xea   : > { %v2945_v14 = vpop.permute.xlu0 %2944  ;;  %v1708_v33 = vsel %vm1697_vm3, %v1675_v59, %v2871_v52  ;;  %v1710_v3 = vsel %vm1697_vm3, %v1677_v35, %v2876_v40  ;;  %v1680_v52 = vsel %vm199_vm0, %v3715_v48, %v2802_v44  ;;  %v587_v48 = vld [vmem:[#allocation2 + $0xa9] sm:$0xff]  ;;  %v588_v40 = vld [vmem:[#allocation2 + $0xb1] sm:$0xff]  ;;  %v2827_v44 = vunpack.i.h.bf16 %v3863_v2 }
  0xeb   : > { %v2947_v39 = vunpack.i.h.bf16 %v2945_v14  ;;  %v2946_v56 = vunpack.i.l.bf16 %v2945_v14  ;;  %3229 = vrot.lane.b32.xlu1 %v3667_v18, %s3427_s26  ;;  %v1711_v14 = vsel %vm1697_vm3, %v1678_v36, %v2877_v21  ;;  %v1679_v36 = vsel %vm199_vm0, %v3713_v45, %v2801_v43 }
  0xec   : > { %3234 = vrot.lane.b32.xlu0 %v3981_v11, %s3427_s26  ;;  %v2826_v43 = vunpack.i.l.bf16 %v3863_v2  ;;  %v1690_v2 = vsel %vm199_vm0, %v3749_v7, %v2827_v44 }
  0xed   : > { %v4010_v20 = vsel %vm1730_vm4, %v1706_v38, %v2946_v56  ;;  %v4013_v18 = vsel %vm1730_vm4, %v1707_v37, %v2947_v39  ;;  %v2950_v57 = vpop.permute.xlu1 %2949  ;;  %v1713_v38 = vsel %vm1697_vm3, %v1680_v52, %v2882_v47 }
  0xee   : > { %v2952_v53 = vunpack.i.h.bf16 %v2950_v57  ;;  %v2951_v22 = vunpack.i.l.bf16 %v2950_v57  ;;  %v2955_v28 = vpop.permute.xlu0 %2954  ;;  %v1689_v47 = vsel %vm199_vm0, %v3747_v6, %v2826_v43 }
  0xef   : > { %v2957_v60 = vunpack.i.h.bf16 %v2955_v28  ;;  %v2956_v55 = vunpack.i.l.bf16 %v2955_v28  ;;  %3239 = vrot.lane.b32.xlu1 %v3671_v19, %s3427_s26 }
  0xf0   : > { %v4024_v23 = vsel %vm1730_vm4, %v1708_v33, %v2951_v22  ;;  %v4027_v59 = vsel %vm1730_vm4, %v1709_v10, %v2952_v53  ;;  %3244 = vrot.lane.b32.xlu0 %v3721_v49, %s3428_s29  ;;  %v1712_v49 = vsel %vm1697_vm3, %v1679_v36, %v2881_v58  ;;  %v604_v10 = vld [vmem:[#allocation2 + $0x171] sm:$0xff]  ;;  %v2907_v33 = vunpack.i.h.bf16 %v3923_v30 }
  0xf1   : > { %4807 = vst [vmem:[#allocation16_spill] sm:$0xff] %v4024_v23  ;;  %4808 = vst [vmem:[#allocation17_spill] sm:$0xff] %v4027_v59  ;;  %v4032_v46 = vsel %vm1730_vm4, %v1710_v3, %v2956_v55  ;;  %v4035_v31 = vsel %vm1730_vm4, %v1711_v14, %v2957_v60  ;;  %v2960_v19 = vpop.permute.xlu1 %2959  ;;  %v2906_v53 = vunpack.i.l.bf16 %v3923_v30  ;;  %v2831_v58 = vunpack.i.l.bf16 %v3869_v5  ;;  %v633_v60 = vld [vmem:[#allocation2 + $0x152] sm:$0xff]  ;;  %v634_v55 = vld [vmem:[#allocation2 + $0x15a] sm:$0xff] }
  0xf2   : > { %4809 = vst [vmem:[#allocation18_spill] sm:$0xff] %v4032_v46  ;;  %4810 = vst [vmem:[#allocation19_spill] sm:$0xff] %v4035_v31  ;;  %v2962_v35 = vunpack.i.h.bf16 %v2960_v19  ;;  %v2961_v39 = vunpack.i.l.bf16 %v2960_v19  ;;  %v4041_v56 = vpop.permute.xlu0 %2964  ;;  %v2911_v3 = vunpack.i.l.bf16 %v3929_v34  ;;  %v1723_v6 = vsel %vm1697_vm3, %v1690_v2, %v2907_v33  ;;  %v636_v2 = vld [vmem:[#allocation2 + $0x172] sm:$0xff]  ;;  %v4824_v59 = vld [vmem:[#allocation13_spill] sm:$0xff] }
  0xf3   : > { %3249 = vrot.lane.b32.xlu1 %v3777_v26, %s3428_s29  ;;  %v603_v26 = vld [vmem:[#allocation2 + $0x169] sm:$0xff]  ;;  %v1722_v7 = vsel %vm1697_vm3, %v1689_v47, %v2906_v53  ;;  %v2886_v31 = vunpack.i.l.bf16 %v3908_v41 }
  0xf4   : > { %v4048_v37 = vsel %vm1730_vm4, %v1712_v49, %v2961_v39  ;;  %v4051_v21 = vsel %vm1730_vm4, %v1713_v38, %v2962_v35  ;;  %3254 = vrot.lane.b32.xlu0 %v3727_v50, %s3428_s29  ;;  %v4067_v50 = vpack.i.bf16 %v588_v40, %v587_v48  ;;  %v4071_v28 = vpack.i.bf16 %v604_v10, %v603_v26  ;;  %v619_v35 = vld [vmem:[#allocation2 + $0xaa] sm:$0xff]  ;;  %v620_v39 = vld [vmem:[#allocation2 + $0xb2] sm:$0xff] }
  0xf5   : > { %4811 = vst [vmem:[#allocation20_spill] sm:$0xff] %v4048_v37  ;;  %4812 = vst [vmem:[#allocation21_spill] sm:$0xff] %v4051_v21  ;;  %v4055_v45 = vpop.permute.xlu1 %2969  ;;  %v1691_v38 = vsel %vm199_vm0, %v3751_v8, %v2831_v58  ;;  %v4109_v8 = vpack.i.bf16 %v620_v39, %v619_v35  ;;  %v635_v53 = vld [vmem:[#allocation2 + $0x16a] sm:$0xff]  ;;  %v2811_v37 = vunpack.i.l.bf16 %v3853_v17 }
  0xf6   : > { %v4059_v57 = vpop.permute.xlu0 %2974  ;;  %v1724_v43 = vsel %vm1697_vm3, %v1691_v38, %v2911_v3  ;;  %v495_v3 = vld [vmem:[#allocation2 + $0xc9] sm:$0xff]  ;;  %v4142_v38 = vld [vmem:[#allocation2 + $0x180] sm:$0xff] }
  0xf7   : > { %3259 = vrot.lane.b32.xlu1 %v3783_v27, %s3428_s29  ;;  %v2832_v27 = vunpack.i.h.bf16 %v3869_v5  ;;  %v543_v35 = vld [vmem:[#allocation2 + $0x18a] sm:$0xff] }
  0xf8   : > { %3264 = vrot.lane.b32.xlu0 %v3940_v54, %s3429_s8  ;;  %v2912_v54 = vunpack.i.h.bf16 %v3929_v34  ;;  %v3288_v34 = vpack.i.bf16 %v634_v55, %v633_v60  ;;  %v4821_v46 = vld [vmem:[#allocation3_spill] sm:$0xff] }
  0xf9   : > { %v4069_v22 = vpop.permute.xlu1 %2979 }
  0xfa   : > { %v2985_v30 = vpop.permute.xlu0 %2984 }
  0xfb   : > { %v2987_v14 = vunpack.i.h.bf16 %v2985_v30  ;;  %v2986_v19 = vunpack.i.l.bf16 %v2985_v30  ;;  %3269 = vrot.lane.b32.xlu1 %v3955_v12, %s3429_s8  ;;  %v1692_v12 = vsel %vm199_vm0, %v3753_v9, %v2832_v27 }
  0xfc   : > { %3274 = vrot.lane.b32.xlu0 %v4067_v50, %s3429_s8  ;;  %v1725_v44 = vsel %vm1697_vm3, %v1692_v12, %v2912_v54  ;;  %v494_v54 = vld [vmem:[#allocation2 + $0xc1] sm:$0xff] }
  0xfd   : > { %v4088_v5 = vsel %vm1730_vm4, %v1722_v7, %v2986_v19  ;;  %v4091_v52 = vsel %vm1730_vm4, %v1723_v6, %v2987_v14  ;;  %v2990_v36 = vpop.permute.xlu1 %2989  ;;  %v511_v19 = vld [vmem:[#allocation2 + $0x189] sm:$0xff]  ;;  %v4138_v12 = vld [vmem:[#allocation2 + $0xc0] sm:$0xff] }
  0xfe   : > { %4813 = vst [vmem:[#allocation22_spill] sm:$0xff] %v4091_v52  ;;  %v2992_v49 = vunpack.i.h.bf16 %v2990_v36  ;;  %v2991_v48 = vunpack.i.l.bf16 %v2990_v36  ;;  %v2995_v40 = vpop.permute.xlu0 %2994  ;;  %v526_v7 = vld [vmem:[#allocation2 + $0xc2] sm:$0xff]  ;;  %v527_v36 = vld [vmem:[#allocation2 + $0xca] sm:$0xff]  ;;  %v2892_v52 = vunpack.i.h.bf16 %v4824_v59 }
  0xff   : > { %v2997_v26 = vunpack.i.h.bf16 %v2995_v40  ;;  %v2996_v10 = vunpack.i.l.bf16 %v2995_v40  ;;  %3279 = vrot.lane.b32.xlu1 %v4071_v28, %s3429_s8  ;;  %v4151_v40 = vld [vmem:[#allocation2 + $0xe0] sm:$0xff] }
 0x100   : > { %v4102_v33 = vsel %vm1730_vm4, %v1724_v43, %v2991_v48  ;;  %v4105_v9 = vsel %vm1730_vm4, %v1725_v44, %v2992_v49  ;;  %3284 = vrot.lane.b32.xlu0 %v3981_v11, %s3430_s9  ;;  %v4122_v11 = vpack.i.bf16 %v636_v2, %v635_v53  ;;  %v4147_v49 = vld [vmem:[#allocation2 + $0x188] sm:$0xff]  ;;  %v4149_v48 = vld [vmem:[#allocation2 + $0xd8] sm:$0xff]  ;;  %v2766_v43 = vunpack.i.l.bf16 %v3811_v16  ;;  %v4160_v53 = vld [vmem:[#allocation2 + $0x1a0] sm:$0xff] }
 0x101   : > { %4814 = vst [vmem:[#allocation23_spill] sm:$0xff] %v4102_v33  ;;  %4815 = vst [vmem:[#allocation24_spill] sm:$0xff] %v4105_v9  ;;  %v4113_v47 = vsel %vm1730_vm4, %v3943_v62, %v2996_v10  ;;  %v4117_v27 = vsel %vm1730_vm4, %v3946_v1, %v2997_v26  ;;  %v3000_v58 = vpop.permute.xlu1 %2999  ;;  %v510_v1 = vld [vmem:[#allocation2 + $0x181] sm:$0xff]  ;;  %v4156_v26 = vpack.i.bf16 %v495_v3, %v494_v54  ;;  %v4158_v10 = vld [vmem:[#allocation2 + $0x198] sm:$0xff]  ;;  %v2772_v54 = vunpack.i.h.bf16 %v3821_v32 }
 0x102   : > { %4816 = vst [vmem:[#allocation25_spill] sm:$0xff] %v4113_v47  ;;  %4817 = vst [vmem:[#allocation26_spill] sm:$0xff] %v4117_v27  ;;  %v3002_v30 = vunpack.i.h.bf16 %v3000_v58  ;;  %v3001_v60 = vunpack.i.l.bf16 %v3000_v58  ;;  %v4119_v55 = vpop.permute.xlu0 %3004  ;;  %v353_v44 = vld [vmem:[#allocation2 + $0x8] sm:$0xff]  ;;  %v352_v2 = vld [vmem:[#allocation2] sm:$0xff]  ;;  %v2771_v58 = vunpack.i.l.bf16 %v3821_v32  ;;  %v2806_v32 = vunpack.i.l.bf16 %v3847_v0 }
 0x103   : > { %3289 = vrot.lane.b32.xlu1 %v3288_v34, %s3430_s9  ;;  %v542_v34 = vld [vmem:[#allocation2 + $0x182] sm:$0xff]  ;;  %v1665_v21 = vsel %vm199_vm0, %v352_v2, %v2766_v43  ;;  %v2846_v43 = vunpack.i.l.bf16 %v3877_v29  ;;  %v1668_v27 = vsel %vm199_vm0, %v3675_v25, %v2772_v54  ;;  %v2851_v47 = vunpack.i.l.bf16 %v3883_v63 }
 0x104   : > { %v4126_v14 = vsel %vm1730_vm4, %v3961_v4, %v3001_v60  ;;  %v4130_v62 = vsel %vm1730_vm4, %v3958_v42, %v3002_v30  ;;  %3294 = vrot.lane.b32.xlu0 %v4109_v8, %s3430_s9  ;;  %v4140_v4 = vld [vmem:[#allocation2 + $0xc8] sm:$0xff]  ;;  %v2767_v42 = vunpack.i.h.bf16 %v3811_v16  ;;  %v4165_v60 = vpack.i.bf16 %v511_v19, %v510_v1  ;;  %v4171_v16 = vld [vmem:[#allocation2 + $0xd9] sm:$0xff] }
 0x105   : > { %4818 = vst [vmem:[#allocation27_spill] sm:$0xff] %v4126_v14  ;;  %4819 = vst [vmem:[#allocation28_spill] sm:$0xff] %v4130_v62  ;;  %v4134_v6 = vpop.permute.xlu1 %3009  ;;  %v4167_v62 = vpack.i.bf16 %v527_v36, %v526_v7  ;;  %v4169_v14 = vpack.i.bf16 %v543_v35, %v542_v34  ;;  %v4184_v19 = vld [vmem:[#allocation2 + $0x199] sm:$0xff]  ;;  %v4186_v7 = vld [vmem:[#allocation2 + $0x1a1] sm:$0xff]  ;;  %v2807_v34 = vunpack.i.h.bf16 %v3847_v0  ;;  %v2812_v1 = vunpack.i.h.bf16 %v3853_v17 }
 0x106   : > { %v4136_v39 = vpop.permute.xlu0 %3014  ;;  %v1666_v36 = vsel %vm199_vm0, %v353_v44, %v2767_v42  ;;  %v4202_v44 = vld [vmem:[#allocation2 + $0xda] sm:$0xff]  ;;  %v4204_v0 = vld [vmem:[#allocation2 + $0xe2] sm:$0xff]  ;;  %v2847_v35 = vunpack.i.h.bf16 %v3877_v29  ;;  %v2852_v42 = vunpack.i.h.bf16 %v3883_v63  ;;  %v1681_v9 = vsel %vm199_vm0, %v4821_v46, %v2806_v32 }
 0x107   : > { %3299 = vrot.lane.b32.xlu1 %v4122_v11, %s3430_s9  ;;  %v2887_v17 = vunpack.i.h.bf16 %v3908_v41  ;;  %v4822_v63 = vld [vmem:[#allocation6_spill] sm:$0xff]  ;;  %v4823_v33 = vld [vmem:[#allocation5_spill] sm:$0xff]  ;;  %v1698_v46 = vsel %vm1697_vm3, %v1665_v21, %v2846_v43  ;;  %v2927_v32 = vunpack.i.h.bf16 %v3948_v15  ;;  %v2932_v21 = vunpack.i.h.bf16 %v3967_v13 }
 0x108   : > { %3304 = vrot.lane.b32.xlu0 %v4067_v50, %s3426_s25  ;;  %v4173_v50 = vld [vmem:[#allocation2 + $0xe1] sm:$0xff]  ;;  %v1684_v54 = vsel %vm199_vm0, %v4822_v63, %v2812_v1  ;;  %v1683_v23 = vsel %vm199_vm0, %v4823_v33, %v2811_v37  ;;  %v1699_v41 = vsel %vm1697_vm3, %v1666_v36, %v2847_v35  ;;  %v1701_v37 = vsel %vm1697_vm3, %v1668_v27, %v2852_v42 }
 0x109   : > { %v4163_v30 = vpop.permute.xlu1 %3019  ;;  %v1714_v33 = vsel %vm1697_vm3, %v1681_v9, %v2886_v31  ;;  %v2967_v35 = vunpack.i.h.bf16 %v4041_v56  ;;  %v2972_v9 = vunpack.i.h.bf16 %v4055_v45  ;;  %v2971_v27 = vunpack.i.l.bf16 %v4055_v45 }
 0x10a   : > { %v4176_v3 = vpop.permute.xlu0 %3024  ;;  %v1732_v42 = vsel %vm1730_vm4, %v1699_v41, %v2927_v32  ;;  %v3011_v43 = vunpack.i.l.bf16 %v4134_v6  ;;  %v3016_v45 = vunpack.i.l.bf16 %v4136_v39  ;;  %v3022_v41 = vunpack.i.h.bf16 %v4163_v30 }
 0x10b   : > { %3309 = vrot.lane.b32.xlu1 %v4071_v28, %s3426_s25  ;;  %v1667_v28 = vsel %vm199_vm0, %v3673_v24, %v2771_v58  ;;  %v4820_v58 = vld [vmem:[#allocation4_spill] sm:$0xff]  ;;  %v4825_v32 = vpack.i.bf16 %v4140_v4, %v4138_v12 }
 0x10c   : > { %3314 = vrot.lane.b32.xlu0 %v4156_v26, %s3426_s25  ;;  %v1682_v29 = vsel %vm199_vm0, %v4820_v58, %v2807_v34  ;;  %v2891_v34 = vunpack.i.l.bf16 %v4824_v59  ;;  %v2926_v58 = vunpack.i.l.bf16 %v3948_v15  ;;  %v1700_v1 = vsel %vm1697_vm3, %v1667_v28, %v2851_v47 }
 0x10d   : > { %v4210_v2 = vpop.permute.xlu1 %3029  ;;  %v2931_v59 = vunpack.i.l.bf16 %v3967_v13  ;;  %v1715_v36 = vsel %vm1697_vm3, %v1682_v29, %v2887_v17  ;;  %v2966_v15 = vunpack.i.l.bf16 %v4041_v56  ;;  %v1717_v47 = vsel %vm1697_vm3, %v1684_v54, %v2892_v52 }
 0x10e   : > { %v4219_v24 = vpop.permute.xlu0 %3034  ;;  %v1716_v31 = vsel %vm1697_vm3, %v1683_v23, %v2891_v34  ;;  %v1731_v13 = vsel %vm1730_vm4, %v1698_v46, %v2926_v58  ;;  %v3007_v56 = vunpack.i.h.bf16 %v4119_v55  ;;  %v3006_v28 = vunpack.i.l.bf16 %v4119_v55 }
 0x10f   : > { %3319 = vrot.lane.b32.xlu1 %v4165_v60, %s3426_s25  ;;  %v1733_v52 = vsel %vm1730_vm4, %v1700_v1, %v2931_v59  ;;  %v3012_v23 = vunpack.i.h.bf16 %v4134_v6  ;;  %v1734_v29 = vsel %vm1730_vm4, %v1701_v37, %v2932_v21  ;;  %v1747_v63 = vsel %vm1730_vm4, %v1714_v33, %v2966_v15 }
 0x110   : > { %3324 = vrot.lane.b32.xlu0 %v4109_v8, %s3427_s26  ;;  %v1748_v54 = vsel %vm1730_vm4, %v1715_v36, %v2967_v35  ;;  %v3017_v55 = vunpack.i.h.bf16 %v4136_v39  ;;  %v1749_v34 = vsel %vm1730_vm4, %v1716_v31, %v2971_v27  ;;  %v1750_v6 = vsel %vm1730_vm4, %v1717_v47, %v2972_v9 }
 0x111   : > { %v4242_v25 = vpop.permute.xlu1 %3039  ;;  %v3021_v46 = vunpack.i.l.bf16 %v4163_v30  ;;  %v1764_v58 = vsel %vm1763_vm5, %v1731_v13, %v3006_v28  ;;  %v1765_v39 = vsel %vm1763_vm5, %v1732_v42, %v3007_v56  ;;  %v3027_v1 = vunpack.i.h.bf16 %v4176_v3 }
 0x112   : > { %v4248_v8 = vpop.permute.xlu0 %3044  ;;  %v3026_v37 = vunpack.i.l.bf16 %v4176_v3  ;;  %v1766_v59 = vsel %vm1763_vm5, %v1733_v52, %v3011_v43  ;;  %v1767_v30 = vsel %vm1763_vm5, %v1734_v29, %v3012_v23  ;;  %v1780_v36 = vsel %vm1763_vm5, %v1747_v63, %v3016_v45 }
 0x113   : > { %3329 = vrot.lane.b32.xlu1 %v4122_v11, %s3427_s26  ;;  %v3031_v12 = vunpack.i.l.bf16 %v4210_v2  ;;  %v1781_v21 = vsel %vm1763_vm5, %v1748_v54, %v3017_v55  ;;  %v3032_v35 = vunpack.i.h.bf16 %v4210_v2  ;;  %v3037_v15 = vunpack.i.h.bf16 %v4219_v24 }
 0x114   : > { %3334 = vrot.lane.b32.xlu0 %v4167_v62, %s3427_s26  ;;  %v3036_v3 = vunpack.i.l.bf16 %v4219_v24  ;;  %v4826_v47 = vpack.i.bf16 %v4147_v49, %v4142_v38  ;;  %v1782_v31 = vsel %vm1763_vm5, %v1749_v34, %v3021_v46  ;;  %v1783_v9 = vsel %vm1763_vm5, %v1750_v6, %v3022_v41 }
 0x115   : > { %v4266_v11 = vpop.permute.xlu1 %3049  ;;  %v3042_v27 = vunpack.i.h.bf16 %v4242_v25  ;;  %v3041_v13 = vunpack.i.l.bf16 %v4242_v25  ;;  %v4827_v2 = vpack.i.bf16 %v4151_v40, %v4149_v48  ;;  %v1797_v24 = vsel %vm1796_vm6, %v1764_v58, %v3026_v37 }
 0x116   : > { %v4272_v17 = vpop.permute.xlu0 %3054  ;;  %v1798_v42 = vsel %vm1796_vm6, %v1765_v39, %v3027_v1  ;;  %v3047_v38 = vunpack.i.h.bf16 %v4248_v8  ;;  %v3046_v49 = vunpack.i.l.bf16 %v4248_v8  ;;  %v1813_v28 = vsel %vm1796_vm6, %v1780_v36, %v3031_v12 }
 0x117   : > { %3339 = vrot.lane.b32.xlu1 %v4169_v14, %s3427_s26  ;;  %v3052_v52 = vunpack.i.h.bf16 %v4266_v11  ;;  %v3051_v25 = vunpack.i.l.bf16 %v4266_v11  ;;  %v3056_v23 = vunpack.i.l.bf16 %v4272_v17  ;;  %v1814_v40 = vsel %vm1796_vm6, %v1781_v21, %v3032_v35 }
 0x118   : > { %3344 = vrot.lane.b32.xlu0 %v4825_v32, %s3428_s29  ;;  %v1799_v43 = vsel %vm1796_vm6, %v1766_v59, %v3036_v3  ;;  %v1800_v45 = vsel %vm1796_vm6, %v1767_v30, %v3037_v15  ;;  %v3057_v29 = vunpack.i.h.bf16 %v4272_v17  ;;  %v4828_v8 = vpack.i.bf16 %v4160_v53, %v4158_v10 }
 0x119   : > { %v4292_v33 = vpop.permute.xlu1 %3059  ;;  %v1815_v63 = vsel %vm1796_vm6, %v1782_v31, %v3041_v13  ;;  %v1816_v11 = vsel %vm1796_vm6, %v1783_v9, %v3042_v27  ;;  %v1830_v34 = vsel %vm1829_vm7, %v1797_v24, %v3046_v49  ;;  %v1831_v6 = vsel %vm1829_vm7, %v1798_v42, %v3047_v38 }
 0x11a   : > { %v3065_v4 = vpop.permute.xlu0 %3064  ;;  %v1846_v32 = vsel %vm1829_vm7, %v1813_v28, %v3051_v25  ;;  %v1847_v10 = vsel %vm1829_vm7, %v1814_v40, %v3052_v52  ;;  %v1832_v53 = vsel %vm1829_vm7, %v1799_v43, %v3056_v23  ;;  %v1833_v1 = vsel %vm1829_vm7, %v1800_v45, %v3057_v29  ;;  %v639_v28 = vld [vmem:[#allocation2 + $0x19a] sm:$0xff]  ;;  %v640_v52 = vld [vmem:[#allocation2 + $0x1a2] sm:$0xff] }
 0x11b   : > { %3349 = vrot.lane.b32.xlu1 %v4826_v47, %s3428_s29  ;;  %v3067_v54 = vunpack.i.h.bf16 %v3065_v4  ;;  %v3066_v55 = vunpack.i.l.bf16 %v3065_v4  ;;  %v3062_v37 = vunpack.i.h.bf16 %v4292_v33  ;;  %v3061_v30 = vunpack.i.l.bf16 %v4292_v33 }
 0x11c   : > { %3354 = vrot.lane.b32.xlu0 %v4827_v2, %s3428_s29  ;;  %v4829_v12 = vpack.i.bf16 %v4173_v50, %v4171_v16  ;;  %v4830_v42 = vpack.i.bf16 %v4186_v7, %v4184_v19 }
 0x11d   : > { %v3070_v56 = vpop.permute.xlu1 %3069  ;;  %v1863_v4 = vsel %vm1862_vm8, %v1830_v34, %v3066_v55  ;;  %v1864_v21 = vsel %vm1862_vm8, %v1831_v6, %v3067_v54  ;;  %v1848_v25 = vsel %vm1829_vm7, %v1815_v63, %v3061_v30  ;;  %v1849_v40 = vsel %vm1829_vm7, %v1816_v11, %v3062_v37  ;;  %v3406_v30 = vld [vmem:[#allocation2 + $0x30] sm:$0xff] }
 0x11e   : > { %v3075_v48 = vpop.permute.xlu0 %3074  ;;  %v3072_v41 = vunpack.i.h.bf16 %v3070_v56  ;;  %v3071_v17 = vunpack.i.l.bf16 %v3070_v56  ;;  %v3398_v63 = vpack.i.bf16 %v640_v52, %v639_v28  ;;  %v4831_v11 = vpack.i.bf16 %v4204_v0, %v4202_v44  ;;  %v4833_v44 = vld [vmem:[#allocation8_spill] sm:$0xff]  ;;  %v3412_v52 = vld [vmem:[#allocation2 + $0x110] sm:$0xff] }
 0x11f   : > { %3359 = vrot.lane.b32.xlu1 %v4828_v8, %s3428_s29  ;;  %v3076_v58 = vunpack.i.l.bf16 %v3075_v48  ;;  %v3077_v36 = vunpack.i.h.bf16 %v3075_v48  ;;  %v2782_v0 = vunpack.i.h.bf16 %v4833_v44 }
 0x120   : > { %3364 = vrot.lane.b32.xlu0 %v4156_v26, %s3429_s8  ;;  %v1879_v47 = vsel %vm1862_vm8, %v1846_v32, %v3071_v17 }
 0x121   : > { %v3080_v46 = vpop.permute.xlu1 %3079  ;;  %v1865_v33 = vsel %vm1862_vm8, %v1832_v53, %v3076_v58  ;;  %v1866_v38 = vsel %vm1862_vm8, %v1833_v1, %v3077_v36  ;;  %v2781_v58 = vunpack.i.l.bf16 %v4833_v44 }
 0x122   : > { %v3085_v39 = vpop.permute.xlu0 %3084  ;;  %v3082_v50 = vunpack.i.h.bf16 %v3080_v46  ;;  %v3081_v13 = vunpack.i.l.bf16 %v3080_v46 }
 0x123   : > { %v3087_v26 = vunpack.i.h.bf16 %v3085_v39  ;;  %v3086_v59 = vunpack.i.l.bf16 %v3085_v39  ;;  %3369 = vrot.lane.b32.xlu1 %v4165_v60, %s3429_s8  ;;  %v1880_v60 = vsel %vm1862_vm8, %v1847_v10, %v3072_v41  ;;  %v4834_v39 = vld [vmem:[#allocation9_spill] sm:$0xff] }
 0x124   : > { %3374 = vrot.lane.b32.xlu0 %v4829_v12, %s3429_s8  ;;  %v1881_v8 = vsel %vm1862_vm8, %v1848_v25, %v3081_v13  ;;  %v1882_v54 = vsel %vm1862_vm8, %v1849_v40, %v3082_v50  ;;  %v2817_v1 = vunpack.i.h.bf16 %v4834_v39  ;;  %v2816_v37 = vunpack.i.l.bf16 %v4834_v39  ;;  %v3408_v50 = vld [vmem:[#allocation2 + $0x50] sm:$0xff] }
 0x125   : > { %v3090_v35 = vpop.permute.xlu1 %3089  ;;  %v1896_v15 = vsel %vm1895_vm9, %v1863_v4, %v3086_v59  ;;  %v1897_v3 = vsel %vm1895_vm9, %v1864_v21, %v3087_v26  ;;  %v4835_v26 = vld [vmem:[#allocation10_spill] sm:$0xff]  ;;  %v4836_v4 = vld [vmem:[#allocation11_spill] sm:$0xff]  ;;  %v1672_v13 = vsel %vm199_vm0, %v3408_v50, %v2782_v0  ;;  %v2981_v39 = vunpack.i.l.bf16 %v4069_v22 }
 0x126   : > { %v3092_v31 = vunpack.i.h.bf16 %v3090_v35  ;;  %v3091_v9 = vunpack.i.l.bf16 %v3090_v35  ;;  %v3095_v27 = vpop.permute.xlu0 %3094  ;;  %v1928_v16 = vpack.c.bf16 %v1897_v3, %v1896_v15  ;;  %v2822_v59 = vunpack.i.h.bf16 %v4835_v26  ;;  %v3407_v3 = vld [vmem:[#allocation2 + $0x38] sm:$0xff] }
 0x127   : > { %v3097_v2 = vunpack.i.h.bf16 %v3095_v27  ;;  %v3096_v24 = vunpack.i.l.bf16 %v3095_v27  ;;  %3379 = vrot.lane.b32.xlu1 %v4830_v42, %s3429_s8  ;;  %v2821_v12 = vunpack.i.l.bf16 %v4835_v26  ;;  %v2857_v21 = vunpack.i.h.bf16 %v4836_v4  ;;  %v3410_v42 = vld [vmem:[#allocation2 + $0xf8] sm:$0xff] }
 0x128   : > { %3384 = vrot.lane.b32.xlu0 %v4167_v62, %s3430_s9  ;;  %2706 = vmatprep.mubr.msk.bf16.mxu0 %vm1964_vm10, %v1928_v16  ;;  %v1912_v49 = vsel %vm1895_vm9, %v1879_v47, %v3091_v9  ;;  %v1913_v56 = vsel %vm1895_vm9, %v1880_v60, %v3092_v31  ;;  %v2856_v35 = vunpack.i.l.bf16 %v4836_v4  ;;  %v4837_v60 = vld [vmem:[#allocation12_spill] sm:$0xff]  ;;  %v4838_v9 = vld [vmem:[#allocation14_spill] sm:$0xff]  ;;  %v1688_v25 = vsel %vm199_vm0, %v3412_v52, %v2822_v59 }
 0x129   : > { %v1898_v23 = vsel %vm1895_vm9, %v1865_v33, %v3096_v24  ;;  %v1899_v19 = vsel %vm1895_vm9, %v1866_v38, %v3097_v2  ;;  %v3100_v7 = vpop.permute.xlu1 %3099  ;;  %v1936_v48 = vpack.c.bf16 %v1913_v56, %v1912_v49  ;;  %v2862_v33 = vunpack.i.h.bf16 %v4837_v60  ;;  %v3409_v2 = vld [vmem:[#allocation2 + $0x48] sm:$0xff]  ;;  %v3411_v56 = vld [vmem:[#allocation2 + $0xf0] sm:$0xff] }
 0x12a   : > { %v1929_v43 = vpack.c.bf16 %v1899_v19, %v1898_v23  ;;  %v3102_v62 = vunpack.i.h.bf16 %v3100_v7  ;;  %v3101_v45 = vunpack.i.l.bf16 %v3100_v7  ;;  %v4369_v29 = vpop.permute.xlu0 %3104  ;;  %v2861_v31 = vunpack.i.l.bf16 %v4837_v60  ;;  %v4839_v23 = vld [vmem:[#allocation15_spill] sm:$0xff] }
 0x12b   : > { %3389 = vrot.lane.b32.xlu1 %v4169_v14, %s3430_s9  ;;  %2722 = vmatprep.mubr.msk.bf16.mxu1 %vm1964_vm10, %v1936_v48  ;;  %v4832_v14 = vld [vmem:[#allocation7_spill] sm:$0xff]  ;;  %v2896_v27 = vunpack.i.l.bf16 %v4838_v9  ;;  %v1671_v24 = vsel %vm199_vm0, %v3409_v2, %v2781_v58  ;;  %v1686_v38 = vsel %vm199_vm0, %v3410_v42, %v2817_v1  ;;  %v2897_v49 = vunpack.i.h.bf16 %v4838_v9  ;;  %v3413_v48 = vld [vmem:[#allocation2 + $0x108] sm:$0xff] }
 0x12c   : > { %v1914_v55 = vsel %vm1895_vm9, %v1881_v8, %v3101_v45  ;;  %v1915_v34 = vsel %vm1895_vm9, %v1882_v54, %v3102_v62  ;;  %3394 = vrot.lane.b32.xlu0 %v4831_v11, %s3430_s9  ;;  %2707 = vmatmul.mubr.msk.bf16.vlgmr.msra.gmra.mrb[0].mxu0 %vm1964_vm10, %v1929_v43  ;;  %v2776_v46 = vunpack.i.l.bf16 %v4832_v14  ;;  %v2777_v10 = vunpack.i.h.bf16 %v4832_v14 }
 0x12d   : > { %v1937_v6 = vpack.c.bf16 %v1915_v34, %v1914_v55  ;;  %v4383_v41 = vpop.permute.xlu1 %3109  ;;  %v1685_v28 = vsel %vm199_vm0, %v3411_v56, %v2816_v37  ;;  %v2902_v19 = vunpack.i.h.bf16 %v4839_v23  ;;  %v2901_v7 = vunpack.i.l.bf16 %v4839_v23 }
 0x12e   : > { %v4385_v17 = vpop.permute.xlu0 %3114  ;;  %v1669_v36 = vsel %vm199_vm0, %v3406_v30, %v2776_v46  ;;  %v1670_v47 = vsel %vm199_vm0, %v3407_v3, %v2777_v10  ;;  %v1687_v40 = vsel %vm199_vm0, %v3413_v48, %v2821_v12  ;;  %v2936_v45 = vunpack.i.l.bf16 %v3971_v51 }
 0x12f   : > { %3399 = vrot.lane.b32.xlu1 %v3398_v63, %s3430_s9  ;;  %2723 = vmatmul.mubr.msk.bf16.vlgmr.msra.gmra.mrb[0].mxu1 %vm1964_vm10, %v1937_v6  ;;  %v1703_v43 = vsel %vm1697_vm3, %v1670_v47, %v2857_v21  ;;  %v1702_v62 = vsel %vm1697_vm3, %v1669_v36, %v2856_v35  ;;  %v1705_v54 = vsel %vm1697_vm3, %v1672_v13, %v2862_v33  ;;  %v2937_v34 = vunpack.i.h.bf16 %v3971_v51 }
 0x130   : > { %v1704_v63 = vsel %vm1697_vm3, %v1671_v24, %v2861_v31  ;;  %v1718_v55 = vsel %vm1697_vm3, %v1685_v28, %v2896_v27  ;;  %v1719_v6 = vsel %vm1697_vm3, %v1686_v38, %v2897_v49  ;;  %v2942_v14 = vunpack.i.h.bf16 %v3987_v61 }
 0x131   : > { %v4390_v32 = vpop.permute.xlu1 %3119  ;;  %v2941_v46 = vunpack.i.l.bf16 %v3987_v61  ;;  %v2976_v10 = vunpack.i.l.bf16 %v4059_v57  ;;  %v1721_v44 = vsel %vm1697_vm3, %v1688_v25, %v2902_v19  ;;  %v1720_v0 = vsel %vm1697_vm3, %v1687_v40, %v2901_v7 }
 0x132   : > { %v4393_v53 = vpop.permute.xlu0 %3124  ;;  %v2977_v58 = vunpack.i.h.bf16 %v4059_v57  ;;  %v1735_v51 = vsel %vm1730_vm4, %v1702_v62, %v2936_v45  ;;  %v2982_v1 = vunpack.i.h.bf16 %v4069_v22  ;;  %v3107_v37 = vunpack.i.h.bf16 %v4369_v29 }
 0x133   : > { %v3106_v26 = vunpack.i.l.bf16 %v4369_v29  ;;  %v1736_v61 = vsel %vm1730_vm4, %v1703_v43, %v2937_v34  ;;  %v3112_v30 = vunpack.i.h.bf16 %v4383_v41  ;;  %v3111_v36 = vunpack.i.l.bf16 %v4383_v41 }
 0x134   : > { %v3117_v12 = vunpack.i.h.bf16 %v4385_v17  ;;  %v1737_v4 = vsel %vm1730_vm4, %v1704_v63, %v2941_v46  ;;  %v1738_v21 = vsel %vm1730_vm4, %v1705_v54, %v2942_v14  ;;  %v1751_v22 = vsel %vm1730_vm4, %v1718_v55, %v2976_v10 }
 0x135   : > { %v4404_v15 = vpop.permute.xlu1 %3129  ;;  %v3116_v35 = vunpack.i.l.bf16 %v4385_v17  ;;  %v1752_v29 = vsel %vm1730_vm4, %v1719_v6, %v2977_v58  ;;  %v1753_v3 = vsel %vm1730_vm4, %v1720_v0, %v2981_v39  ;;  %v3122_v47 = vunpack.i.h.bf16 %v4390_v32 }
 0x136   : > { %v4410_v16 = vpop.permute.xlu0 %3134  ;;  %v3121_v60 = vunpack.i.l.bf16 %v4390_v32  ;;  %v1754_v41 = vsel %vm1730_vm4, %v1721_v44, %v2982_v1  ;;  %v1768_v33 = vsel %vm1763_vm5, %v1735_v51, %v3106_v26  ;;  %v1769_v31 = vsel %vm1763_vm5, %v1736_v61, %v3107_v37 }
 0x137   : > { %v3126_v9 = vunpack.i.l.bf16 %v4393_v53  ;;  %v1784_v17 = vsel %vm1763_vm5, %v1751_v22, %v3111_v36  ;;  %v1785_v50 = vsel %vm1763_vm5, %v1752_v29, %v3112_v30  ;;  %v1771_v13 = vsel %vm1763_vm5, %v1738_v21, %v3117_v12 }
 0x138   : > { %v3127_v2 = vunpack.i.h.bf16 %v4393_v53  ;;  %v1770_v32 = vsel %vm1763_vm5, %v1737_v4, %v3116_v35  ;;  %v3132_v42 = vunpack.i.h.bf16 %v4404_v15  ;;  %v3131_v38 = vunpack.i.l.bf16 %v4404_v15 }
 0x139   : > { %v4424_v8 = vpop.permute.xlu1 %3139  ;;  %v3136_v49 = vunpack.i.l.bf16 %v4410_v16  ;;  %v1786_v56 = vsel %vm1763_vm5, %v1753_v3, %v3121_v60  ;;  %v1787_v28 = vsel %vm1763_vm5, %v1754_v41, %v3122_v47  ;;  %v3137_v52 = vunpack.i.h.bf16 %v4410_v16 }
 0x13a   : > { %v4430_v11 = vpop.permute.xlu0 %3144  ;;  %v3141_v25 = vunpack.i.l.bf16 %v4424_v8  ;;  %v1801_v23 = vsel %vm1796_vm6, %v1768_v33, %v3126_v9  ;;  %v3142_v53 = vunpack.i.h.bf16 %v4424_v8  ;;  %v1802_v15 = vsel %vm1796_vm6, %v1769_v31, %v3127_v2 }
 0x13b   : > { %v3147_v19 = vunpack.i.h.bf16 %v4430_v11  ;;  %v3146_v7 = vunpack.i.l.bf16 %v4430_v11  ;;  %v1817_v54 = vsel %vm1796_vm6, %v1784_v17, %v3131_v38  ;;  %v1818_v16 = vsel %vm1796_vm6, %v1785_v50, %v3132_v42 }
 0x13c   : > { %v1803_v63 = vsel %vm1796_vm6, %v1770_v32, %v3136_v49  ;;  %v1804_v8 = vsel %vm1796_vm6, %v1771_v13, %v3137_v52  ;;  %v1819_v34 = vsel %vm1796_vm6, %v1786_v56, %v3141_v25  ;;  %v1820_v14 = vsel %vm1796_vm6, %v1787_v28, %v3142_v53 }
 0x13d   : > { %v3150_v59 = vpop.permute.xlu1 %3149  ;;  %v1834_v46 = vsel %vm1829_vm7, %v1801_v23, %v3146_v7  ;;  %v1835_v10 = vsel %vm1829_vm7, %v1802_v15, %v3147_v19 }
 0x13e   : > { %v3155_v57 = vpop.permute.xlu0 %3154  ;;  %v3152_v40 = vunpack.i.h.bf16 %v3150_v59  ;;  %v3151_v43 = vunpack.i.l.bf16 %v3150_v59 }
 0x13f   : > { %v3156_v62 = vunpack.i.l.bf16 %v3155_v57  ;;  %v3157_v55 = vunpack.i.h.bf16 %v3155_v57 }
 0x140   : > { %v1850_v58 = vsel %vm1829_vm7, %v1817_v54, %v3151_v43  ;;  %v1851_v39 = vsel %vm1829_vm7, %v1818_v16, %v3152_v40 }
 0x141   : > { %v4460_v27 = vpop.permute.xlu1 %3159  ;;  %v1836_v51 = vsel %vm1829_vm7, %v1803_v63, %v3156_v62  ;;  %v1837_v26 = vsel %vm1829_vm7, %v1804_v8, %v3157_v55 }
 0x142   : > { %v3165_v24 = vpop.permute.xlu0 %3164  ;;  %v3162_v59 = vunpack.i.h.bf16 %v4460_v27  ;;  %v3161_v21 = vunpack.i.l.bf16 %v4460_v27 }
 0x143   : > { %v3167_v6 = vunpack.i.h.bf16 %v3165_v24  ;;  %v3166_v11 = vunpack.i.l.bf16 %v3165_v24 }
 0x144   : > { %v1852_v42 = vsel %vm1829_vm7, %v1819_v34, %v3161_v21  ;;  %v1853_v52 = vsel %vm1829_vm7, %v1820_v14, %v3162_v59 }
 0x145   : > { %v3170_v48 = vpop.permute.xlu1 %3169  ;;  %v1867_v36 = vsel %vm1862_vm8, %v1834_v46, %v3166_v11  ;;  %v1868_v12 = vsel %vm1862_vm8, %v1835_v10, %v3167_v6 }
 0x146   : > { %v3175_v45 = vpop.permute.xlu0 %3174  ;;  %v3171_v44 = vunpack.i.l.bf16 %v3170_v48  ;;  %v3172_v1 = vunpack.i.h.bf16 %v3170_v48 }
 0x147   : > { %v3177_v57 = vunpack.i.h.bf16 %v3175_v45  ;;  %v3176_v4 = vunpack.i.l.bf16 %v3175_v45 }
 0x148   : > { %v1883_v22 = vsel %vm1862_vm8, %v1850_v58, %v3171_v44  ;;  %v1884_v47 = vsel %vm1862_vm8, %v1851_v39, %v3172_v1 }
 0x149   : > { %v3180_v0 = vpop.permute.xlu1 %3179  ;;  %v1869_v2 = vsel %vm1862_vm8, %v1836_v51, %v3176_v4  ;;  %v1870_v27 = vsel %vm1862_vm8, %v1837_v26, %v3177_v57 }
 0x14a   : > { %v3185_v37 = vpop.permute.xlu0 %3184  ;;  %v3182_v9 = vunpack.i.h.bf16 %v3180_v0  ;;  %v3181_v17 = vunpack.i.l.bf16 %v3180_v0 }
 0x14b   : > { %v3187_v61 = vunpack.i.h.bf16 %v3185_v37  ;;  %v3186_v30 = vunpack.i.l.bf16 %v3185_v37 }
 0x14c   : > { %v1885_v7 = vsel %vm1862_vm8, %v1852_v42, %v3181_v17  ;;  %v1886_v48 = vsel %vm1862_vm8, %v1853_v52, %v3182_v9 }
 0x14d   : > { %v1900_v35 = vsel %vm1895_vm9, %v1867_v36, %v3186_v30  ;;  %v1901_v29 = vsel %vm1895_vm9, %v1868_v12, %v3187_v61  ;;  %v3190_v3 = vpop.permute.xlu1 %3189  ;;  %v4840_v30 = vld [vmem:[#allocation22_spill] sm:$0xff]  ;;  %v4841_v12 = vld [vmem:[#allocation17_spill] sm:$0xff] }
 0x14e   : > { %v1930_v60 = vpack.c.bf16 %v1901_v29, %v1900_v35  ;;  %v3192_v41 = vunpack.i.h.bf16 %v3190_v3  ;;  %v3191_v33 = vunpack.i.l.bf16 %v3190_v3  ;;  %v3195_v31 = vpop.permute.xlu0 %3194  ;;  %v4843_v3 = vld [vmem:[#allocation23_spill] sm:$0xff] }
 0x14f   : > { %v3197_v50 = vunpack.i.h.bf16 %v3195_v31  ;;  %v3196_v13 = vunpack.i.l.bf16 %v3195_v31 }
 0x150   : > { %v1916_v24 = vsel %vm1895_vm9, %v1883_v22, %v3191_v33  ;;  %v1917_v32 = vsel %vm1895_vm9, %v1884_v47, %v3192_v41  ;;  %2710 = vmatprep.mubr.msk.bf16.mxu0 %vm1964_vm10, %v1930_v60  ;;  %v4842_v22 = vld [vmem:[#allocation16_spill] sm:$0xff] }
 0x151   : > { %v1938_v38 = vpack.c.bf16 %v1917_v32, %v1916_v24  ;;  %v1902_v49 = vsel %vm1895_vm9, %v1869_v2, %v3196_v13  ;;  %v1903_v56 = vsel %vm1895_vm9, %v1870_v27, %v3197_v50  ;;  %v3200_v28 = vpop.permute.xlu1 %3199  ;;  %v4844_v60 = vld [vmem:[#allocation24_spill] sm:$0xff] }
 0x152   : > { %v1931_v25 = vpack.c.bf16 %v1903_v56, %v1902_v49  ;;  %v3202_v23 = vunpack.i.h.bf16 %v3200_v28  ;;  %v3201_v53 = vunpack.i.l.bf16 %v3200_v28  ;;  %v3205_v19 = vpop.permute.xlu0 %3204 }
 0x153   : > { %2726 = vmatprep.mubr.msk.bf16.mxu1 %vm1964_vm10, %v1938_v38  ;;  %v3207_v6 = vunpack.i.h.bf16 %v3205_v19  ;;  %v3206_v11 = vunpack.i.l.bf16 %v3205_v19 }
 0x154   : > { %v1918_v15 = vsel %vm1895_vm9, %v1885_v7, %v3201_v53  ;;  %v1919_v40 = vsel %vm1895_vm9, %v1886_v48, %v3202_v23  ;;  %2711 = vmatmul.mubr.msk.bf16.gmra.mrb[4].mxu0 %vm1964_vm10, %v1931_v25 }
 0x155   : > { %v1939_v43 = vpack.c.bf16 %v1919_v40, %v1918_v15  ;;  %v3210_v62 = vpop.permute.xlu1 %3209  ;;  %v1772_v1 = vsel %vm1763_vm5, %v4010_v20, %v3206_v11  ;;  %v1773_v37 = vsel %vm1763_vm5, %v4013_v18, %v3207_v6 }
 0x156   : > { %v3215_v45 = vpop.permute.xlu0 %3214  ;;  %v3212_v46 = vunpack.i.h.bf16 %v3210_v62  ;;  %v3211_v10 = vunpack.i.l.bf16 %v3210_v62 }
 0x157   : > { %2727 = vmatmul.mubr.msk.bf16.gmra.mrb[4].mxu1 %vm1964_vm10, %v1939_v43  ;;  %v3217_v44 = vunpack.i.h.bf16 %v3215_v45  ;;  %v3216_v58 = vunpack.i.l.bf16 %v3215_v45 }
 0x158   : > { %v1788_v61 = vsel %vm1763_vm5, %v4088_v5, %v3211_v10  ;;  %v1789_v36 = vsel %vm1763_vm5, %v4840_v30, %v3212_v46 }
 0x159   : > { %v3220_v54 = vpop.permute.xlu1 %3219  ;;  %v1775_v57 = vsel %vm1763_vm5, %v4841_v12, %v3217_v44  ;;  %v1774_v20 = vsel %vm1763_vm5, %v4842_v22, %v3216_v58 }
 0x15a   : > { %v3225_v16 = vpop.permute.xlu0 %3224  ;;  %v3222_v39 = vunpack.i.h.bf16 %v3220_v54  ;;  %v3221_v51 = vunpack.i.l.bf16 %v3220_v54 }
 0x15b   : > { %v3226_v26 = vunpack.i.l.bf16 %v3225_v16  ;;  %v3227_v4 = vunpack.i.h.bf16 %v3225_v16 }
 0x15c   : > { %v1790_v47 = vsel %vm1763_vm5, %v4843_v3, %v3221_v51  ;;  %v1791_v5 = vsel %vm1763_vm5, %v4844_v60, %v3222_v39 }
 0x15d   : > { %v3230_v63 = vpop.permute.xlu1 %3229  ;;  %v1805_v31 = vsel %vm1796_vm6, %v1772_v1, %v3226_v26  ;;  %v1806_v2 = vsel %vm1796_vm6, %v1773_v37, %v3227_v4 }
 0x15e   : > { %v3235_v55 = vpop.permute.xlu0 %3234  ;;  %v3232_v35 = vunpack.i.h.bf16 %v3230_v63  ;;  %v3231_v29 = vunpack.i.l.bf16 %v3230_v63 }
 0x15f   : > { %v3236_v18 = vunpack.i.l.bf16 %v3235_v55  ;;  %v3237_v41 = vunpack.i.h.bf16 %v3235_v55 }
 0x160   : > { %v1821_v38 = vsel %vm1796_vm6, %v1788_v61, %v3231_v29  ;;  %v1822_v49 = vsel %vm1796_vm6, %v1789_v36, %v3232_v35 }
 0x161   : > { %v3240_v8 = vpop.permute.xlu1 %3239  ;;  %v1807_v56 = vsel %vm1796_vm6, %v1774_v20, %v3236_v18  ;;  %v1808_v52 = vsel %vm1796_vm6, %v1775_v57, %v3237_v41 }
 0x162   : > { %v3245_v34 = vpop.permute.xlu0 %3244  ;;  %v3241_v33 = vunpack.i.l.bf16 %v3240_v8  ;;  %v3242_v9 = vunpack.i.h.bf16 %v3240_v8 }
 0x163   : > { %v3247_v17 = vunpack.i.h.bf16 %v3245_v34  ;;  %v3246_v50 = vunpack.i.l.bf16 %v3245_v34 }
 0x164   : > { %v1823_v25 = vsel %vm1796_vm6, %v1790_v47, %v3241_v33  ;;  %v1824_v19 = vsel %vm1796_vm6, %v1791_v5, %v3242_v9 }
 0x165   : > { %v3250_v14 = vpop.permute.xlu1 %3249  ;;  %v1838_v7 = vsel %vm1829_vm7, %v1805_v31, %v3246_v50  ;;  %v1839_v48 = vsel %vm1829_vm7, %v1806_v2, %v3247_v17 }
 0x166   : > { %v3255_v0 = vpop.permute.xlu0 %3254  ;;  %v3252_v27 = vunpack.i.h.bf16 %v3250_v14  ;;  %v3251_v24 = vunpack.i.l.bf16 %v3250_v14 }
 0x167   : > { %v3256_v32 = vunpack.i.l.bf16 %v3255_v0  ;;  %v3257_v28 = vunpack.i.h.bf16 %v3255_v0 }
 0x168   : > { %v1854_v43 = vsel %vm1829_vm7, %v1821_v38, %v3251_v24  ;;  %v1855_v62 = vsel %vm1829_vm7, %v1822_v49, %v3252_v27 }
 0x169   : > { %v4519_v59 = vpop.permute.xlu1 %3259  ;;  %v1840_v45 = vsel %vm1829_vm7, %v1807_v56, %v3256_v32  ;;  %v1841_v63 = vsel %vm1829_vm7, %v1808_v52, %v3257_v28 }
 0x16a   : > { %v3265_v21 = vpop.permute.xlu0 %3264  ;;  %v3262_v55 = vunpack.i.h.bf16 %v4519_v59  ;;  %v3261_v10 = vunpack.i.l.bf16 %v4519_v59 }
 0x16b   : > { %v3267_v23 = vunpack.i.h.bf16 %v3265_v21  ;;  %v3266_v53 = vunpack.i.l.bf16 %v3265_v21 }
 0x16c   : > { %v1856_v20 = vsel %vm1829_vm7, %v1823_v25, %v3261_v10  ;;  %v1857_v47 = vsel %vm1829_vm7, %v1824_v19, %v3262_v55  ;;  %v4847_v55 = vld [vmem:[#allocation25_spill] sm:$0xff] }
 0x16d   : > { %v3270_v13 = vpop.permute.xlu1 %3269  ;;  %v1871_v6 = vsel %vm1862_vm8, %v1838_v7, %v3266_v53  ;;  %v1872_v11 = vsel %vm1862_vm8, %v1839_v48, %v3267_v23 }
 0x16e   : > { %v3275_v42 = vpop.permute.xlu0 %3274  ;;  %v3271_v15 = vunpack.i.l.bf16 %v3270_v13  ;;  %v3272_v54 = vunpack.i.h.bf16 %v3270_v13 }
 0x16f   : > { %v3277_v14 = vunpack.i.h.bf16 %v3275_v42  ;;  %v3276_v46 = vunpack.i.l.bf16 %v3275_v42 }
 0x170   : > { %v1887_v44 = vsel %vm1862_vm8, %v1854_v43, %v3271_v15  ;;  %v1888_v51 = vsel %vm1862_vm8, %v1855_v62, %v3272_v54  ;;  %v4845_v43 = vld [vmem:[#allocation18_spill] sm:$0xff] }
 0x171   : > { %v3280_v40 = vpop.permute.xlu1 %3279  ;;  %v1873_v4 = vsel %vm1862_vm8, %v1840_v45, %v3276_v46  ;;  %v1874_v59 = vsel %vm1862_vm8, %v1841_v63, %v3277_v14  ;;  %v4846_v45 = vld [vmem:[#allocation19_spill] sm:$0xff] }
 0x172   : > { %v3285_v16 = vpop.permute.xlu0 %3284  ;;  %v3282_v30 = vunpack.i.h.bf16 %v3280_v40  ;;  %v3281_v36 = vunpack.i.l.bf16 %v3280_v40 }
 0x173   : > { %v3287_v8 = vunpack.i.h.bf16 %v3285_v16  ;;  %v3286_v34 = vunpack.i.l.bf16 %v3285_v16 }
 0x174   : > { %v1889_v31 = vsel %vm1862_vm8, %v1856_v20, %v3281_v36  ;;  %v1890_v9 = vsel %vm1862_vm8, %v1857_v47, %v3282_v30 }
 0x175   : > { %v1904_v0 = vsel %vm1895_vm9, %v1871_v6, %v3286_v34  ;;  %v1905_v58 = vsel %vm1895_vm9, %v1872_v11, %v3287_v8  ;;  %v3290_v39 = vpop.permute.xlu1 %3289  ;;  %v4848_v34 = vld [vmem:[#allocation26_spill] sm:$0xff]  ;;  %v4849_v11 = vld [vmem:[#allocation21_spill] sm:$0xff] }
 0x176   : > { %v1932_v1 = vpack.c.bf16 %v1905_v58, %v1904_v0  ;;  %v3292_v37 = vunpack.i.h.bf16 %v3290_v39  ;;  %v3291_v26 = vunpack.i.l.bf16 %v3290_v39  ;;  %v3295_v61 = vpop.permute.xlu0 %3294 }
 0x177   : > { %v3297_v12 = vunpack.i.h.bf16 %v3295_v61  ;;  %v3296_v57 = vunpack.i.l.bf16 %v3295_v61 }
 0x178   : > { %v1920_v21 = vsel %vm1895_vm9, %v1887_v44, %v3291_v26  ;;  %v1921_v22 = vsel %vm1895_vm9, %v1888_v51, %v3292_v37  ;;  %2714 = vmatprep.mubr.msk.bf16.mxu0 %vm1964_vm10, %v1932_v1  ;;  %v4850_v44 = vld [vmem:[#allocation20_spill] sm:$0xff]  ;;  %v4851_v1 = vld [vmem:[#allocation27_spill] sm:$0xff] }
 0x179   : > { %v1940_v35 = vpack.c.bf16 %v1921_v22, %v1920_v21  ;;  %v1906_v29 = vsel %vm1895_vm9, %v1873_v4, %v3296_v57  ;;  %v1907_v18 = vsel %vm1895_vm9, %v1874_v59, %v3297_v12  ;;  %v3300_v3 = vpop.permute.xlu1 %3299  ;;  %v4852_v26 = vld [vmem:[#allocation28_spill] sm:$0xff] }
 0x17a   : > { %v1933_v60 = vpack.c.bf16 %v1907_v18, %v1906_v29  ;;  %v3302_v5 = vunpack.i.h.bf16 %v3300_v3  ;;  %v3301_v41 = vunpack.i.l.bf16 %v3300_v3  ;;  %v3305_v33 = vpop.permute.xlu0 %3304 }
 0x17b   : > { %2730 = vmatprep.mubr.msk.bf16.mxu1 %vm1964_vm10, %v1940_v35  ;;  %v3307_v28 = vunpack.i.h.bf16 %v3305_v33  ;;  %v3306_v52 = vunpack.i.l.bf16 %v3305_v33 }
 0x17c   : > { %v1922_v17 = vsel %vm1895_vm9, %v1889_v31, %v3301_v41  ;;  %v1923_v50 = vsel %vm1895_vm9, %v1890_v9, %v3302_v5  ;;  %2715 = vmatmul.mubr.msk.bf16.gmra.mrb[8].mxu0 %vm1964_vm10, %v1933_v60 }
 0x17d   : > { %v1941_v13 = vpack.c.bf16 %v1923_v50, %v1922_v17  ;;  %v3310_v2 = vpop.permute.xlu1 %3309  ;;  %v1776_v62 = vsel %vm1763_vm5, %v4845_v43, %v3306_v52  ;;  %v1777_v54 = vsel %vm1763_vm5, %v4846_v45, %v3307_v28 }
 0x17e   : > { %v3315_v27 = vpop.permute.xlu0 %3314  ;;  %v3312_v23 = vunpack.i.h.bf16 %v3310_v2  ;;  %v3311_v53 = vunpack.i.l.bf16 %v3310_v2 }
 0x17f   : > { %2731 = vmatmul.mubr.msk.bf16.gmra.mrb[8].mxu1 %vm1964_vm10, %v1941_v13  ;;  %v3317_v19 = vunpack.i.h.bf16 %v3315_v27  ;;  %v3316_v48 = vunpack.i.l.bf16 %v3315_v27 }
 0x180   : > { %v1792_v8 = vsel %vm1763_vm5, %v4847_v55, %v3311_v53  ;;  %v1793_v6 = vsel %vm1763_vm5, %v4848_v34, %v3312_v23 }
 0x181   : > { %v3320_v24 = vpop.permute.xlu1 %3319  ;;  %v1779_v14 = vsel %vm1763_vm5, %v4849_v11, %v3317_v19  ;;  %v1778_v0 = vsel %vm1763_vm5, %v4850_v44, %v3316_v48 }
 0x182   : > { %v3325_v32 = vpop.permute.xlu0 %3324  ;;  %v3322_v15 = vunpack.i.h.bf16 %v3320_v24  ;;  %v3321_v40 = vunpack.i.l.bf16 %v3320_v24 }
 0x183   : > { %v3326_v16 = vunpack.i.l.bf16 %v3325_v32  ;;  %v3327_v46 = vunpack.i.h.bf16 %v3325_v32 }
 0x184   : > { %v1794_v37 = vsel %vm1763_vm5, %v4851_v1, %v3321_v40  ;;  %v1795_v61 = vsel %vm1763_vm5, %v4852_v26, %v3322_v15 }
 0x185   : > { %v3330_v42 = vpop.permute.xlu1 %3329  ;;  %v1809_v12 = vsel %vm1796_vm6, %v1776_v62, %v3326_v16  ;;  %v1810_v22 = vsel %vm1796_vm6, %v1777_v54, %v3327_v46 }
 0x186   : > { %v3335_v38 = vpop.permute.xlu0 %3334  ;;  %v3332_v58 = vunpack.i.h.bf16 %v3330_v42  ;;  %v3331_v39 = vunpack.i.l.bf16 %v3330_v42 }
 0x187   : > { %v3336_v51 = vunpack.i.l.bf16 %v3335_v38  ;;  %v3337_v30 = vunpack.i.h.bf16 %v3335_v38 }
 0x188   : > { %v1825_v3 = vsel %vm1796_vm6, %v1792_v8, %v3331_v39  ;;  %v1826_v47 = vsel %vm1796_vm6, %v1793_v6, %v3332_v58 }
 0x189   : > { %v3340_v49 = vpop.permute.xlu1 %3339  ;;  %v1811_v60 = vsel %vm1796_vm6, %v1778_v0, %v3336_v51  ;;  %v1812_v41 = vsel %vm1796_vm6, %v1779_v14, %v3337_v30 }
 0x18a   : > { %v3345_v56 = vpop.permute.xlu0 %3344  ;;  %v3341_v36 = vunpack.i.l.bf16 %v3340_v49  ;;  %v3342_v57 = vunpack.i.h.bf16 %v3340_v49 }
 0x18b   : > { %v3347_v4 = vunpack.i.h.bf16 %v3345_v56  ;;  %v3346_v59 = vunpack.i.l.bf16 %v3345_v56 }
 0x18c   : > { %v1827_v33 = vsel %vm1796_vm6, %v1794_v37, %v3341_v36  ;;  %v1828_v17 = vsel %vm1796_vm6, %v1795_v61, %v3342_v57 }
 0x18d   : > { %v3350_v25 = vpop.permute.xlu1 %3349  ;;  %v1842_v50 = vsel %vm1829_vm7, %v1809_v12, %v3346_v59  ;;  %v1843_v13 = vsel %vm1829_vm7, %v1810_v22, %v3347_v4 }
 0x18e   : > { %v3355_v7 = vpop.permute.xlu0 %3354  ;;  %v3352_v20 = vunpack.i.h.bf16 %v3350_v25  ;;  %v3351_v35 = vunpack.i.l.bf16 %v3350_v25 }
 0x18f   : > { %v3356_v29 = vunpack.i.l.bf16 %v3355_v7  ;;  %v3357_v5 = vunpack.i.h.bf16 %v3355_v7 }
 0x190   : > { %v1858_v24 = vsel %vm1829_vm7, %v1825_v3, %v3351_v35  ;;  %v1859_v32 = vsel %vm1829_vm7, %v1826_v47, %v3352_v20  ;;  %v4635_v20 = vld [vmem:[%s4778_s3] ss:$0 sm:$0xff] }
 0x191   : > { %v4575_v63 = vpop.permute.xlu1 %3359  ;;  %v1844_v42 = vsel %vm1829_vm7, %v1811_v60, %v3356_v29  ;;  %v1845_v56 = vsel %vm1829_vm7, %v1812_v41, %v3357_v5 }
 0x192   : > { %v3365_v10 = vpop.permute.xlu0 %3364  ;;  %v3362_v28 = vunpack.i.h.bf16 %v4575_v63  ;;  %v3361_v48 = vunpack.i.l.bf16 %v4575_v63 }
 0x193   : > { %v3367_v31 = vunpack.i.h.bf16 %v3365_v10  ;;  %v3366_v9 = vunpack.i.l.bf16 %v3365_v10 }
 0x194   : > { %v1860_v0 = vsel %vm1829_vm7, %v1827_v33, %v3361_v48  ;;  %v1861_v37 = vsel %vm1829_vm7, %v1828_v17, %v3362_v28 }
 0x195   : > { %v3370_v21 = vpop.permute.xlu1 %3369  ;;  %v1875_v23 = vsel %vm1862_vm8, %v1842_v50, %v3366_v9  ;;  %v1876_v53 = vsel %vm1862_vm8, %v1843_v13, %v3367_v31 }
 0x196   : > { %v3375_v18 = vpop.permute.xlu0 %3374  ;;  %v3371_v2 = vunpack.i.l.bf16 %v3370_v21  ;;  %v3372_v38 = vunpack.i.h.bf16 %v3370_v21  ;;  %v4630_v21 = vld [vmem:[%s4777_s2] ss:$0 sm:$0xff] }
 0x197   : > { %v3377_v19 = vunpack.i.h.bf16 %v3375_v18  ;;  %v3376_v7 = vunpack.i.l.bf16 %v3375_v18 }
 0x198   : > { %v1891_v15 = vsel %vm1862_vm8, %v1858_v24, %v3371_v2  ;;  %v1892_v45 = vsel %vm1862_vm8, %v1859_v32, %v3372_v38 }
 0x199   : > { %v3380_v27 = vpop.permute.xlu1 %3379  ;;  %v1877_v46 = vsel %vm1862_vm8, %v1844_v42, %v3376_v7  ;;  %v1878_v63 = vsel %vm1862_vm8, %v1845_v56, %v3377_v19 }
 0x19a   : > { %v3385_v49 = vpop.permute.xlu0 %3384  ;;  %v3382_v34 = vunpack.i.h.bf16 %v3380_v27  ;;  %v3381_v6 = vunpack.i.l.bf16 %v3380_v27 }
 0x19b   : > { %v3387_v52 = vunpack.i.h.bf16 %v3385_v49  ;;  %v3386_v25 = vunpack.i.l.bf16 %v3385_v49 }
 0x19c   : > { %v1893_v36 = vsel %vm1862_vm8, %v1860_v0, %v3381_v6  ;;  %v1894_v12 = vsel %vm1862_vm8, %v1861_v37, %v3382_v34 }
 0x19d   : > { %v1908_v40 = vsel %vm1895_vm9, %v1875_v23, %v3386_v25  ;;  %v1909_v43 = vsel %vm1895_vm9, %v1876_v53, %v3387_v52  ;;  %v3390_v62 = vpop.permute.xlu1 %3389 }
 0x19e   : > { %v1934_v54 = vpack.c.bf16 %v1909_v43, %v1908_v40  ;;  %v3392_v16 = vunpack.i.h.bf16 %v3390_v62  ;;  %v3391_v55 = vunpack.i.l.bf16 %v3390_v62  ;;  %v3395_v8 = vpop.permute.xlu0 %3394 }
 0x19f   : > { %v3397_v11 = vunpack.i.h.bf16 %v3395_v8  ;;  %v3396_v14 = vunpack.i.l.bf16 %v3395_v8 }
 0x1a0   : > { %v1924_v10 = vsel %vm1895_vm9, %v1891_v15, %v3391_v55  ;;  %v1925_v44 = vsel %vm1895_vm9, %v1892_v45, %v3392_v16  ;;  %2718 = vmatprep.mubr.msk.bf16.mxu0 %vm1964_vm10, %v1934_v54 }
 0x1a1   : > { %v1942_v58 = vpack.c.bf16 %v1925_v44, %v1924_v10  ;;  %v1910_v39 = vsel %vm1895_vm9, %v1877_v46, %v3396_v14  ;;  %v1911_v51 = vsel %vm1895_vm9, %v1878_v63, %v3397_v11  ;;  %v3400_v1 = vpop.permute.xlu1 %3399 }
 0x1a2   : > { %v1935_v26 = vpack.c.bf16 %v1911_v51, %v1910_v39  ;;  %v3402_v61 = vunpack.i.h.bf16 %v3400_v1  ;;  %v3401_v30 = vunpack.i.l.bf16 %v3400_v1 }
 0x1a3   : > { %2734 = vmatprep.mubr.msk.bf16.mxu1 %vm1964_vm10, %v1942_v58 }
 0x1a4   : > { %v1926_v57 = vsel %vm1895_vm9, %v1893_v36, %v3401_v30  ;;  %v1927_v4 = vsel %vm1895_vm9, %v1894_v12, %v3402_v61  ;;  %2719 = vmatmul.mubr.msk.bf16.gmra.mrb[12].mxu0 %vm1964_vm10, %v1935_v26 }
 0x1a5   : > { %v1943_v59 = vpack.c.bf16 %v1927_v4, %v1926_v57 }
 0x1a7   : > { %2735 = vmatmul.mubr.msk.bf16.gmra.mrb[12].mxu1 %vm1964_vm10, %v1943_v59 }
 0x1ff   : > { %v2708_v22 = vpop.f32.mrb[0].mxu0 }
 0x200   : > { %v2187_v35 = vmul.f32 %v2708_v22, %v4630_v21  ;;  %v2051_v29 = vpop.f32.mrb[1].mxu0 }
 0x201   : > { %v2185_v18 = vmul.f32 %v4630_v21, %v2051_v29  ;;  %v2709_v3 = vpop.f32.mrb[2].mxu0 }
 0x202   : > { %v2226_v47 = vadd.f32 %v4635_v20, %v2187_v35  ;;  %v2188_v60 = vmul.f32 %v2709_v3, %v4630_v21  ;;  %v2054_v5 = vpop.f32.mrb[3].mxu0  ;;  %v2724_v41 = vpop.f32.mrb[0].mxu1 }
 0x203   : > { %v2224_v33 = vadd.f32 %v4635_v20, %v2185_v18  ;;  %v2186_v31 = vmul.f32 %v4630_v21, %v2054_v5  ;;  %v2203_v9 = vmul.f32 %v2724_v41, %v4630_v21  ;;  %v2115_v17 = vpop.f32.mrb[1].mxu1 }
 0x204   : > { %v2258_v50 = vmax.f32 %v2226_v47, 0.0  ;;  %v2227_v13 = vadd.f32 %v4635_v20, %v2188_v60  ;;  %v2201_v2 = vmul.f32 %v4630_v21, %v2115_v17  ;;  %v2725_v27 = vpop.f32.mrb[2].mxu1 }
 0x205   : > { %v2256_v24 = vmax.f32 %v2224_v33, 0.0  ;;  %v2225_v32 = vadd.f32 %v4635_v20, %v2186_v31  ;;  %v2242_v42 = vadd.f32 %v4635_v20, %v2203_v9  ;;  %v2204_v38 = vmul.f32 %v2725_v27, %v4630_v21  ;;  %v2118_v49 = vpop.f32.mrb[3].mxu1 }
 0x206   : > { %v2572_v56 = vpack.c.bf16 %v2258_v50, %v2258_v50  ;;  %v2259_v28 = vmax.f32 %v2227_v13, 0.0  ;;  %v2240_v52 = vadd.f32 %v4635_v20, %v2201_v2  ;;  %v2202_v25 = vmul.f32 %v4630_v21, %v2118_v49 }
 0x207   : > { %v2570_v23 = vpack.c.bf16 %v2256_v24, %v2256_v24  ;;  %v2257_v53 = vmax.f32 %v2225_v32, 0.0  ;;  %v2274_v19 = vmax.f32 %v2242_v42, 0.0  ;;  %v2243_v7 = vadd.f32 %v4635_v20, %v2204_v38 }
 0x208   : > { %2419 = vst.msk [vmem:[%s4651_s19 + $0x8] sm:$0xf] %vm2416_vm11, %v2572_v56  ;;  %v2573_v48 = vpack.c.bf16 %v2259_v28, %v2259_v28  ;;  %v2272_v15 = vmax.f32 %v2240_v52, 0.0  ;;  %v2241_v40 = vadd.f32 %v4635_v20, %v2202_v25 }
 0x209   : > { %2417 = vst.msk [vmem:[%s4651_s19] sm:$0xf] %vm2416_vm11, %v2570_v23  ;;  %v2571_v43 = vpack.c.bf16 %v2257_v53, %v2257_v53  ;;  %v2588_v62 = vpack.c.bf16 %v2274_v19, %v2274_v19  ;;  %v2275_v45 = vmax.f32 %v2243_v7, 0.0 }
 0x20a   : > { %2420 = vst.msk [vmem:[%s4651_s19 + $0xc] sm:$0xf] %vm2416_vm11, %v2573_v48  ;;  %v2586_v54 = vpack.c.bf16 %v2272_v15, %v2272_v15  ;;  %v2273_v16 = vmax.f32 %v2241_v40, 0.0 }
 0x20b   : > { %2418 = vst.msk [vmem:[%s4651_s19 + $0x4] sm:$0xf] %vm2416_vm11, %v2571_v43  ;;  %2435 = vst.msk [vmem:[%s4651_s19 + $0x48] sm:$0xf] %vm2416_vm11, %v2588_v62  ;;  %v2589_v55 = vpack.c.bf16 %v2275_v45, %v2275_v45 }
 0x20c   : > { %2433 = vst.msk [vmem:[%s4651_s19 + $0x40] sm:$0xf] %vm2416_vm11, %v2586_v54  ;;  %v2587_v8 = vpack.c.bf16 %v2273_v16, %v2273_v16 }
 0x20d   : > { %2436 = vst.msk [vmem:[%s4651_s19 + $0x4c] sm:$0xf] %vm2416_vm11, %v2589_v55 }
 0x20e   : > { %2434 = vst.msk [vmem:[%s4651_s19 + $0x44] sm:$0xf] %vm2416_vm11, %v2587_v8 }
 0x227   : > { %v2712_v34 = vpop.f32.mrb[4].mxu0 }
 0x228   : > { %v2191_v6 = vmul.f32 %v2712_v34, %v4630_v21  ;;  %v2067_v11 = vpop.f32.mrb[5].mxu0 }
 0x229   : > { %v2189_v14 = vmul.f32 %v4630_v21, %v2067_v11  ;;  %v2713_v46 = vpop.f32.mrb[6].mxu0 }
 0x22a   : > { %v2230_v63 = vadd.f32 %v4635_v20, %v2191_v6  ;;  %v2192_v10 = vmul.f32 %v2713_v46, %v4630_v21  ;;  %v2070_v44 = vpop.f32.mrb[7].mxu0  ;;  %v2728_v0 = vpop.f32.mrb[4].mxu1 }
 0x22b   : > { %v2228_v58 = vadd.f32 %v4635_v20, %v2189_v14  ;;  %v2190_v39 = vmul.f32 %v4630_v21, %v2070_v44  ;;  %v2207_v51 = vmul.f32 %v2728_v0, %v4630_v21  ;;  %v2131_v1 = vpop.f32.mrb[5].mxu1 }
 0x22c   : > { %v2262_v37 = vmax.f32 %v2230_v63, 0.0  ;;  %v2231_v26 = vadd.f32 %v4635_v20, %v2192_v10  ;;  %v2205_v61 = vmul.f32 %v4630_v21, %v2131_v1  ;;  %v2729_v30 = vpop.f32.mrb[6].mxu1 }
 0x22d   : > { %v2260_v36 = vmax.f32 %v2228_v58, 0.0  ;;  %v2229_v12 = vadd.f32 %v4635_v20, %v2190_v39  ;;  %v2246_v57 = vadd.f32 %v4635_v20, %v2207_v51  ;;  %v2208_v4 = vmul.f32 %v2729_v30, %v4630_v21  ;;  %v2134_v59 = vpop.f32.mrb[7].mxu1 }
 0x22e   : > { %v2576_v22 = vpack.c.bf16 %v2262_v37, %v2262_v37  ;;  %v2263_v35 = vmax.f32 %v2231_v26, 0.0  ;;  %v2244_v29 = vadd.f32 %v4635_v20, %v2205_v61  ;;  %v2206_v18 = vmul.f32 %v4630_v21, %v2134_v59 }
 0x22f   : > { %v2574_v3 = vpack.c.bf16 %v2260_v36, %v2260_v36  ;;  %v2261_v47 = vmax.f32 %v2229_v12, 0.0  ;;  %v2278_v60 = vmax.f32 %v2246_v57, 0.0  ;;  %v2247_v5 = vadd.f32 %v4635_v20, %v2208_v4 }
 0x230   : > { %2423 = vst.msk [vmem:[%s4651_s19 + $0x18] sm:$0xf] %vm2416_vm11, %v2576_v22  ;;  %v2577_v41 = vpack.c.bf16 %v2263_v35, %v2263_v35  ;;  %v2276_v33 = vmax.f32 %v2244_v29, 0.0  ;;  %v2245_v31 = vadd.f32 %v4635_v20, %v2206_v18 }
 0x231   : > { %2421 = vst.msk [vmem:[%s4651_s19 + $0x10] sm:$0xf] %vm2416_vm11, %v2574_v3  ;;  %v2575_v9 = vpack.c.bf16 %v2261_v47, %v2261_v47  ;;  %v2592_v17 = vpack.c.bf16 %v2278_v60, %v2278_v60  ;;  %v2279_v50 = vmax.f32 %v2247_v5, 0.0 }
 0x232   : > { %2424 = vst.msk [vmem:[%s4651_s19 + $0x1c] sm:$0xf] %vm2416_vm11, %v2577_v41  ;;  %v2590_v13 = vpack.c.bf16 %v2276_v33, %v2276_v33  ;;  %v2277_v2 = vmax.f32 %v2245_v31, 0.0 }
 0x233   : > { %2422 = vst.msk [vmem:[%s4651_s19 + $0x14] sm:$0xf] %vm2416_vm11, %v2575_v9  ;;  %2439 = vst.msk [vmem:[%s4651_s19 + $0x58] sm:$0xf] %vm2416_vm11, %v2592_v17  ;;  %v2593_v27 = vpack.c.bf16 %v2279_v50, %v2279_v50 }
 0x234   : > { %2437 = vst.msk [vmem:[%s4651_s19 + $0x50] sm:$0xf] %vm2416_vm11, %v2590_v13  ;;  %v2591_v24 = vpack.c.bf16 %v2277_v2, %v2277_v2 }
 0x235   : > { %2440 = vst.msk [vmem:[%s4651_s19 + $0x5c] sm:$0xf] %vm2416_vm11, %v2593_v27 }
 0x236   : > { %2438 = vst.msk [vmem:[%s4651_s19 + $0x54] sm:$0xf] %vm2416_vm11, %v2591_v24 }
 0x24f   : > { %v2716_v32 = vpop.f32.mrb[8].mxu0 }
 0x250   : > { %v2195_v42 = vmul.f32 %v2716_v32, %v4630_v21  ;;  %v2083_v38 = vpop.f32.mrb[9].mxu0 }
 0x251   : > { %v2193_v49 = vmul.f32 %v4630_v21, %v2083_v38  ;;  %v2717_v56 = vpop.f32.mrb[10].mxu0 }
 0x252   : > { %v2234_v28 = vadd.f32 %v4635_v20, %v2195_v42  ;;  %v2196_v52 = vmul.f32 %v2717_v56, %v4630_v21  ;;  %v2086_v25 = vpop.f32.mrb[11].mxu0  ;;  %v2732_v23 = vpop.f32.mrb[8].mxu1 }
 0x253   : > { %v2232_v53 = vadd.f32 %v4635_v20, %v2193_v49  ;;  %v2194_v19 = vmul.f32 %v4630_v21, %v2086_v25  ;;  %v2211_v7 = vmul.f32 %v2732_v23, %v4630_v21  ;;  %v2147_v48 = vpop.f32.mrb[9].mxu1 }
 0x254   : > { %v2266_v15 = vmax.f32 %v2234_v28, 0.0  ;;  %v2235_v40 = vadd.f32 %v4635_v20, %v2196_v52  ;;  %v2209_v43 = vmul.f32 %v4630_v21, %v2147_v48  ;;  %v2733_v62 = vpop.f32.mrb[10].mxu1 }
 0x255   : > { %v2264_v45 = vmax.f32 %v2232_v53, 0.0  ;;  %v2233_v54 = vadd.f32 %v4635_v20, %v2194_v19  ;;  %v2250_v16 = vadd.f32 %v4635_v20, %v2211_v7  ;;  %v2212_v55 = vmul.f32 %v2733_v62, %v4630_v21  ;;  %v2150_v8 = vpop.f32.mrb[11].mxu1 }
 0x256   : > { %v2580_v34 = vpack.c.bf16 %v2266_v15, %v2266_v15  ;;  %v2267_v6 = vmax.f32 %v2235_v40, 0.0  ;;  %v2248_v11 = vadd.f32 %v4635_v20, %v2209_v43  ;;  %v2210_v14 = vmul.f32 %v4630_v21, %v2150_v8 }
 0x257   : > { %v2578_v46 = vpack.c.bf16 %v2264_v45, %v2264_v45  ;;  %v2265_v63 = vmax.f32 %v2233_v54, 0.0  ;;  %v2282_v10 = vmax.f32 %v2250_v16, 0.0  ;;  %v2251_v44 = vadd.f32 %v4635_v20, %v2212_v55 }
 0x258   : > { %2427 = vst.msk [vmem:[%s4651_s19 + $0x28] sm:$0xf] %vm2416_vm11, %v2580_v34  ;;  %v2581_v0 = vpack.c.bf16 %v2267_v6, %v2267_v6  ;;  %v2280_v58 = vmax.f32 %v2248_v11, 0.0  ;;  %v2249_v39 = vadd.f32 %v4635_v20, %v2210_v14 }
 0x259   : > { %2425 = vst.msk [vmem:[%s4651_s19 + $0x20] sm:$0xf] %vm2416_vm11, %v2578_v46  ;;  %v2579_v51 = vpack.c.bf16 %v2265_v63, %v2265_v63  ;;  %v2596_v1 = vpack.c.bf16 %v2282_v10, %v2282_v10  ;;  %v2283_v37 = vmax.f32 %v2251_v44, 0.0 }
 0x25a   : > { %2428 = vst.msk [vmem:[%s4651_s19 + $0x2c] sm:$0xf] %vm2416_vm11, %v2581_v0  ;;  %v2594_v26 = vpack.c.bf16 %v2280_v58, %v2280_v58  ;;  %v2281_v61 = vmax.f32 %v2249_v39, 0.0 }
 0x25b   : > { %2426 = vst.msk [vmem:[%s4651_s19 + $0x24] sm:$0xf] %vm2416_vm11, %v2579_v51  ;;  %2443 = vst.msk [vmem:[%s4651_s19 + $0x68] sm:$0xf] %vm2416_vm11, %v2596_v1  ;;  %v2597_v30 = vpack.c.bf16 %v2283_v37, %v2283_v37 }
 0x25c   : > { %2441 = vst.msk [vmem:[%s4651_s19 + $0x60] sm:$0xf] %vm2416_vm11, %v2594_v26  ;;  %v2595_v36 = vpack.c.bf16 %v2281_v61, %v2281_v61 }
 0x25d   : > { %2444 = vst.msk [vmem:[%s4651_s19 + $0x6c] sm:$0xf] %vm2416_vm11, %v2597_v30 }
 0x25e   : > { %2442 = vst.msk [vmem:[%s4651_s19 + $0x64] sm:$0xf] %vm2416_vm11, %v2595_v36 }
 0x277   : > { %v2720_v12 = vpop.f32.mrb[12].mxu0 }
 0x278   : > { %v2199_v57 = vmul.f32 %v2720_v12, %v4630_v21  ;;  %v2099_v4 = vpop.f32.mrb[13].mxu0 }
 0x279   : > { %v2197_v59 = vmul.f32 %v4630_v21, %v2099_v4  ;;  %v2721_v22 = vpop.f32.mrb[14].mxu0 }
 0x27a   : > { %v2238_v35 = vadd.f32 %v4635_v20, %v2199_v57  ;;  %v2200_v29 = vmul.f32 %v2721_v22, %v4630_v21  ;;  %v2102_v18 = vpop.f32.mrb[15].mxu0  ;;  %v2736_v3 = vpop.f32.mrb[12].mxu1 }
 0x27b   : > { %v2236_v47 = vadd.f32 %v4635_v20, %v2197_v59  ;;  %v2198_v60 = vmul.f32 %v4630_v21, %v2102_v18  ;;  %v2215_v5 = vmul.f32 %v2736_v3, %v4630_v21  ;;  %v2163_v41 = vpop.f32.mrb[13].mxu1 }
 0x27c   : > { %v2270_v33 = vmax.f32 %v2238_v35, 0.0  ;;  %v2239_v31 = vadd.f32 %v4635_v20, %v2200_v29  ;;  %v2213_v9 = vmul.f32 %v4630_v21, %v2163_v41  ;;  %v2737_v17 = vpop.f32.mrb[14].mxu1 }
 0x27d   : > { %v2268_v50 = vmax.f32 %v2236_v47, 0.0  ;;  %v2237_v13 = vadd.f32 %v4635_v20, %v2198_v60  ;;  %v2254_v2 = vadd.f32 %v4635_v20, %v2215_v5  ;;  %v2216_v27 = vmul.f32 %v2737_v17, %v4630_v21  ;;  %v2166_v24 = vpop.f32.mrb[15].mxu1 }
 0x27e   : > { %v2584_v32 = vpack.c.bf16 %v2270_v33, %v2270_v33  ;;  %v2271_v42 = vmax.f32 %v2239_v31, 0.0  ;;  %v2252_v38 = vadd.f32 %v4635_v20, %v2213_v9  ;;  %v2214_v49 = vmul.f32 %v4630_v21, %v2166_v24 }
 0x27f   : > { %v2582_v56 = vpack.c.bf16 %v2268_v50, %v2268_v50  ;;  %v2269_v28 = vmax.f32 %v2237_v13, 0.0  ;;  %v2286_v52 = vmax.f32 %v2254_v2, 0.0  ;;  %v2255_v25 = vadd.f32 %v4635_v20, %v2216_v27 }
 0x280   : > { %2431 = vst.msk [vmem:[%s4651_s19 + $0x38] sm:$0xf] %vm2416_vm11, %v2584_v32  ;;  %v2585_v23 = vpack.c.bf16 %v2271_v42, %v2271_v42  ;;  %v2284_v53 = vmax.f32 %v2252_v38, 0.0  ;;  %v2253_v19 = vadd.f32 %v4635_v20, %v2214_v49 }
 0x281   : > { %2429 = vst.msk [vmem:[%s4651_s19 + $0x30] sm:$0xf] %vm2416_vm11, %v2582_v56  ;;  %v2583_v7 = vpack.c.bf16 %v2269_v28, %v2269_v28  ;;  %v2600_v21 = vpack.c.bf16 %v2286_v52, %v2286_v52  ;;  %v2287_v48 = vmax.f32 %v2255_v25, 0.0 }
 0x282   : > { %2432 = vst.msk [vmem:[%s4651_s19 + $0x3c] sm:$0xf] %vm2416_vm11, %v2585_v23  ;;  %v2598_v15 = vpack.c.bf16 %v2284_v53, %v2284_v53  ;;  %v2285_v40 = vmax.f32 %v2253_v19, 0.0 }
 0x283   : > { %2430 = vst.msk [vmem:[%s4651_s19 + $0x34] sm:$0xf] %vm2416_vm11, %v2583_v7  ;;  %2447 = vst.msk [vmem:[%s4651_s19 + $0x78] sm:$0xf] %vm2416_vm11, %v2600_v21  ;;  %v2601_v43 = vpack.c.bf16 %v2287_v48, %v2287_v48 }
 0x284   : > { %2445 = vst.msk [vmem:[%s4651_s19 + $0x70] sm:$0xf] %vm2416_vm11, %v2598_v15  ;;  %v2599_v62 = vpack.c.bf16 %v2285_v40, %v2285_v40 }
 0x285   : > { %2448 = vst.msk [vmem:[%s4651_s19 + $0x7c] sm:$0xf] %vm2416_vm11, %v2601_v43 }
 0x286   : > { %2446 = vst.msk [vmem:[%s4651_s19 + $0x74] sm:$0xf] %vm2416_vm11, %v2599_v62 }
 0x287 PF: > { %s14_s15 = sadd.s32 1, %s3420_s15  }
 0x288   : > { %p11_p4 = scmp.ge.s32.totalorder %s14_s15, 4  }
 0x28a   :  { %13 = sbr.rel (!%p11_p4) target bundleno = 1 (0x1), region = 68 }

</bundles_post_ra>
